<compile_context>
chip_gen: v7x
topology: tpu7x:2x2x1
jax: 0.10.0
libtpu: 0.0.40
codegen_flags: <defaults>
</compile_context>

<pallas_src>
import jax
import jax.numpy as jnp
from jax.experimental import pallas as pl
from jax.experimental.pallas import tpu as pltpu

LANE = 128


def _round_up(x, m):
    return (x + m - 1) // m * m


def _images_per_grid_step(n):
    """Batch-folding policy.

    Single-TensorCore parts (v5e / v6e): fold the whole batch into one grid
    step (per-step fixed overhead dominates this tiny workload).
    Multi-core parts (v7x, v4/v5p megacore): keep one image per grid step so
    the "parallel" grid programs land on different TensorCores.
    """
    try:
        kind = jax.devices()[0].device_kind.lower()
    except Exception:
        return 1
    single_core = any(t in kind for t in ("v5e", "v6e", "lite"))
    return n if single_core else 1


# ------------------------------------------------------------------
# Fused kernel: in-kernel im2col conv (9 narrow MXU matmuls) + bias + ReLU
#               + GAP (f32 MXU mat-vec against a masked pooling vector)
#               + fc.  `bn` images per grid program (statically unrolled).
# ------------------------------------------------------------------
def _make_fused_kernel(bn, cfeat, ppix, tap_starts):
    def kernel(x_ref, wc_ref, bc_ref, wf_ref, bf_ref, pool_ref,
               feats_ref, logits_ref):
        # x_ref     : (bn, Cin, PADPIX)  compute dtype  halo-padded flat image
        # wc_ref    : (9, CPAD, Cin)     compute dtype  per-tap conv weights
        # bc_ref    : (CPAD, 1)          f32            conv bias (zero-padded)
        # wf_ref    : (NCPAD, CPAD)      compute dtype  fc weight (torch layout, padded)
        # bf_ref    : (NCPAD, 1)         f32            fc bias (zero-padded)
        # pool_ref  : (PPIX, 1)          f32            1/(H*W) on interior pixels, 0 on halo
        # feats_ref : (bn, Cfeat, PPIX)  compute dtype  conv activations (hook target)
        # logits_ref: (bn, NCPAD, 1)     f32
        cd = wf_ref.dtype
        for i in range(bn):  # static unroll over images in this block
            # features_conv: 3x3 SAME conv as 9 narrow MXU matmuls.
            # Tap (kh, kw) of padded-grid pixel q reads flat pixel
            # q + (kh-1)*PW + (kw-1) of the halo-padded image -> a static
            # lane-offset window of the input ref.
            acc = None
            for t, s in enumerate(tap_starts):
                xs = x_ref[i, :, pl.ds(s, ppix)]                  # (Cin, PPIX)
                d = jnp.dot(wc_ref[t], xs,
                            preferred_element_type=jnp.float32)   # (CPAD, PPIX)
                acc = d if acc is None else acc + d
            f_t = jnp.maximum(acc + bc_ref[...], 0.0)             # bias + ReLU

            # Activations already in (channels, pixels) orientation -> lane-dense
            # store of only the real channels (no 4x channel padding in HBM).
            feats_ref[i] = f_t[:cfeat].astype(feats_ref.dtype)

            # Global average pool: one f32 MXU mat-vec; the pooling vector holds
            # 1/(H*W) on interior pixels and 0 on the SAME-pad ring, so masking,
            # mean and scaling are fused into the matmul.
            pooled = jnp.dot(f_t, pool_ref[...],
                             preferred_element_type=jnp.float32)  # (CPAD, 1)

            # classifier (Linear).  Zero-padded rows/cols have no effect.
            logits = jnp.dot(wf_ref[...], pooled.astype(cd),
                             preferred_element_type=jnp.float32)  # (NCPAD, 1)
            logits_ref[i] = logits + bf_ref[...]

    return kernel


# ------------------------------------------------------------------
# Wrapper
# ------------------------------------------------------------------
def gradcam_forward(x_nchw, params, compute_dtype=jnp.bfloat16):
    """GradCAM forward.  Returns (logits, conv_activations_nchw).

    x_nchw: (N, Cin, H, W) float32 (PyTorch layout).
    compute_dtype: MXU operand / activation-storage dtype
                   (bf16 = fast path; f32 = exact correctness path).
    """
    N, Cin, H, W = x_nchw.shape
    Cfeat = params["w_conv"].shape[0]
    num_classes = params["w_fc"].shape[0]

    PH, PW = H + 2, W + 2                  # conv SAME-padded grid
    PPIX = PH * PW                         # pixels the kernel computes (ring discarded later)
    halo_rows = -(-(PW + 1) // PW)         # extra zero rows so every tap window stays in-bounds
    PADPIX = (PH + 2 * halo_rows) * PW
    base = halo_rows * PW                  # flat offset of grid pixel 0 in the padded image
    CPAD = _round_up(Cfeat, LANE)
    NCPAD = _round_up(num_classes, LANE)
    tap_starts = [base + (kh - 1) * PW + (kw - 1)
                  for kh in range(3) for kw in range(3)]

    # Input prep: a single pad (SAME ring + halo rows), flatten pixels, cast.
    xp = jnp.pad(x_nchw, ((0, 0), (0, 0),
                          (1 + halo_rows, 1 + halo_rows), (1, 1)))
    xflat = xp.reshape(N, Cin, PADPIX).astype(compute_dtype)

    # Conv weights: torch OIHW (Cfeat, Cin, 3, 3) -> per-tap (9, Cfeat, Cin),
    # output-channel dim zero-padded to the sublane-dense CPAD.
    wct = jnp.transpose(params["w_conv"], (2, 3, 0, 1)).reshape(9, Cfeat, Cin)
    wct = jnp.pad(wct, ((0, 0), (0, CPAD - Cfeat), (0, 0))).astype(compute_dtype)
    bc = jnp.pad(params["b_conv"].reshape(Cfeat, 1),
                 ((0, CPAD - Cfeat), (0, 0))).astype(jnp.float32)
    # fc: torch Linear weight (num_classes, Cfeat) used as-is (column orientation).
    wf = jnp.pad(params["w_fc"],
                 ((0, NCPAD - num_classes), (0, CPAD - Cfeat))).astype(compute_dtype)
    bf = jnp.pad(params["b_fc"].reshape(num_classes, 1),
                 ((0, NCPAD - num_classes), (0, 0))).astype(jnp.float32)
    # Pooling vector: 1/(H*W) on interior pixels, 0 on the SAME-pad ring.
    pool = jnp.zeros((PH, PW), jnp.float32).at[1:H + 1, 1:W + 1].set(
        1.0 / float(H * W)).reshape(PPIX, 1)

    bn = _images_per_grid_step(N)          # images per grid step (1 or N)
    grid = (N // bn,)

    cd_size = jnp.dtype(compute_dtype).itemsize
    flops = N * (2 * 9 * CPAD * Cin * PPIX + 2 * CPAD * PPIX + 2 * NCPAD * CPAD)
    bytes_accessed = (N * Cin * PADPIX * cd_size
                      + (9 * CPAD * Cin + NCPAD * CPAD) * cd_size
                      + (CPAD + NCPAD + PPIX) * 4
                      + N * Cfeat * PPIX * cd_size
                      + N * NCPAD * 4)

    kernel = _make_fused_kernel(bn, Cfeat, PPIX, tap_starts)
    feats_pad, logits_pad = pl.pallas_call(
        kernel,
        out_shape=(
            jax.ShapeDtypeStruct((N, Cfeat, PPIX), compute_dtype),  # activations
            jax.ShapeDtypeStruct((N, NCPAD, 1), jnp.float32),       # logits (padded)
        ),
        grid_spec=pltpu.PrefetchScalarGridSpec(
            num_scalar_prefetch=0,
            grid=grid,
            in_specs=[
                pl.BlockSpec((bn, Cin, PADPIX), lambda n: (n, 0, 0)),
                # Weight / bias / pool operands: constant index_map -> fetched
                # once, not re-DMA'd on later grid steps.
                pl.BlockSpec((9, CPAD, Cin), lambda n: (0, 0, 0)),
                pl.BlockSpec((CPAD, 1), lambda n: (0, 0)),
                pl.BlockSpec((NCPAD, CPAD), lambda n: (0, 0)),
                pl.BlockSpec((NCPAD, 1), lambda n: (0, 0)),
                pl.BlockSpec((PPIX, 1), lambda n: (0, 0)),
            ],
            out_specs=[
                pl.BlockSpec((bn, Cfeat, PPIX), lambda n: (n, 0, 0)),
                pl.BlockSpec((bn, NCPAD, 1), lambda n: (n, 0, 0)),
            ],
        ),
        compiler_params=pltpu.CompilerParams(
            dimension_semantics=("parallel",),
            vmem_limit_bytes=32 * 1024 * 1024,
        ),
        cost_estimate=pl.CostEstimate(
            flops=flops, transcendentals=0, bytes_accessed=bytes_accessed),
    )(xflat, wct, bc, wf, bf, pool)

    logits = logits_pad[:, :num_classes, 0]
    feats_nchw = feats_pad.reshape(N, Cfeat, PH, PW)[:, :, 1:H + 1, 1:W + 1]
    return logits, feats_nchw


def init_params(key, Cin, Cfeat, num_classes):
    k1, k2, k3, k4 = jax.random.split(key, 4)
    return {
        # torch Conv2d weight layout (Cout, Cin, 3, 3)
        "w_conv": jax.random.normal(k1, (Cfeat, Cin, 3, 3), jnp.float32) * 0.1,
        "b_conv": jax.random.normal(k2, (Cfeat,), jnp.float32) * 0.01,
        # torch Linear weight layout (num_classes, Cfeat)
        "w_fc": jax.random.normal(k3, (num_classes, Cfeat), jnp.float32) * 0.1,
        "b_fc": jax.random.normal(k4, (num_classes,), jnp.float32) * 0.01,
    }


# ------------------------------------------------------------------
# Pure-JAX reference (gold standard, HIGHEST precision)
# ------------------------------------------------------------------
def reference_forward(x_nchw, params):
    x_nhwc = jnp.transpose(x_nchw, (0, 2, 3, 1))
    w_hwio = jnp.transpose(params["w_conv"], (2, 3, 1, 0))      # OIHW -> HWIO
    feats = jax.lax.conv_general_dilated(
        x_nhwc, w_hwio, window_strides=(1, 1), padding="SAME",
        dimension_numbers=("NHWC", "HWIO", "NHWC"),
        precision=jax.lax.Precision.HIGHEST)
    feats = jnp.maximum(feats + params["b_conv"].reshape(1, 1, 1, -1), 0.0)
    pooled = jnp.mean(feats, axis=(1, 2))
    logits = jnp.dot(pooled, params["w_fc"].T,
                     precision=jax.lax.Precision.HIGHEST) + params["b_fc"]
    return logits, jnp.transpose(feats, (0, 3, 1, 2))


if __name__ == "__main__":
    N, Cin, H, W = 2, 4, 16, 16
    Cfeat, num_classes = 32, 8

    key = jax.random.PRNGKey(0)
    kx, kp = jax.random.split(key)
    x = jax.random.normal(kx, (N, Cin, H, W), jnp.float32)
    params = init_params(kp, Cin, Cfeat, num_classes)

    ref_logits, ref_feats = reference_forward(x, params)

    fwd = jax.jit(gradcam_forward, static_argnames=("compute_dtype",))

    # Exactness path: f32 operands and f32 activations.
    logits32, feats32 = fwd(x, params, compute_dtype=jnp.float32)
    jax.block_until_ready((logits32, feats32))
    assert logits32.shape == (N, num_classes), logits32.shape
    assert feats32.shape == (N, Cfeat, H, W), feats32.shape
    assert jnp.allclose(logits32, ref_logits, atol=2e-3, rtol=2e-3), "f32 logits mismatch"
    assert jnp.allclose(feats32, ref_feats, atol=2e-3, rtol=2e-3), "f32 feats mismatch"

    # Fast path: bf16 operands + bf16 activation storage, f32 accumulation.
    logits_bf, feats_bf = fwd(x, params, compute_dtype=jnp.bfloat16)
    jax.block_until_ready(logits_bf)
    assert feats_bf.shape == (N, Cfeat, H, W), feats_bf.shape
    assert jnp.allclose(logits_bf, ref_logits, atol=5e-2, rtol=5e-2), "bf16 logits mismatch"

    print("KERNEL_OK")
</pallas_src>

<mosaic_0001>
module attributes {stable_mosaic.version = 11 : i64} {
  func.func @kernel(%arg0: i32, %arg1: memref<1x4x396xf32, #tpu.memory_space<vmem>>, %arg2: memref<9x128x4xf32, #tpu.memory_space<vmem>>, %arg3: memref<128x1xf32, #tpu.memory_space<vmem>>, %arg4: memref<128x128xf32, #tpu.memory_space<vmem>>, %arg5: memref<128x1xf32, #tpu.memory_space<vmem>>, %arg6: memref<324x1xf32, #tpu.memory_space<vmem>>, %arg7: memref<1x32x324xf32, #tpu.memory_space<vmem>>, %arg8: memref<1x128x1xf32, #tpu.memory_space<vmem>>) attributes {dimension_semantics = [#tpu.dimension_semantics<parallel>], iteration_bounds = array<i64: 2>, scalar_prefetch = 0 : i64, scratch_operands = 0 : i64, tpu.core_type = #tpu.core_type<tc>, window_params = [{transform_indices = @transform_0, window_bounds = array<i64: 1, 4, 396>}, {pipeline_mode = #tpu.pipeline_mode<synchronous>, transform_indices = @transform_1, window_bounds = array<i64: 9, 128, 4>}, {pipeline_mode = #tpu.pipeline_mode<synchronous>, transform_indices = @transform_2, window_bounds = array<i64: 128, 1>}, {pipeline_mode = #tpu.pipeline_mode<synchronous>, transform_indices = @transform_3, window_bounds = array<i64: 128, 128>}, {pipeline_mode = #tpu.pipeline_mode<synchronous>, transform_indices = @transform_4, window_bounds = array<i64: 128, 1>}, {pipeline_mode = #tpu.pipeline_mode<synchronous>, transform_indices = @transform_5, window_bounds = array<i64: 324, 1>}, {transform_indices = @transform_6, window_bounds = array<i64: 1, 32, 324>}, {transform_indices = @transform_7, window_bounds = array<i64: 1, 128, 1>}]} {
    %c0 = arith.constant 0 : index
    %c0_0 = arith.constant 0 : index
    %c17 = arith.constant 17 : index
    %0 = vector.load %arg1[%c0, %c0_0, %c17] : memref<1x4x396xf32, #tpu.memory_space<vmem>>, vector<1x4x324xf32>
    %1 = vector.shape_cast %0 : vector<1x4x324xf32> to vector<4x324xf32>
    %c0_1 = arith.constant 0 : index
    %c0_2 = arith.constant 0 : index
    %c0_3 = arith.constant 0 : index
    %2 = vector.load %arg2[%c0_1, %c0_2, %c0_3] : memref<9x128x4xf32, #tpu.memory_space<vmem>>, vector<1x128x4xf32>
    %3 = vector.shape_cast %2 : vector<1x128x4xf32> to vector<128x4xf32>
    %cst = arith.constant dense<0.000000e+00> : vector<128x324xf32>
    %4 = tpu.matmul %3, %1, %cst {dimension_numbers = #tpu.dot_dimension_numbers<[1], [0], [0], [1], [0, 0, 1, 1], [], []>} : vector<128x4xf32>, vector<4x324xf32>, vector<128x324xf32> -> vector<128x324xf32>
    %c0_4 = arith.constant 0 : index
    %c0_5 = arith.constant 0 : index
    %c18 = arith.constant 18 : index
    %5 = vector.load %arg1[%c0_4, %c0_5, %c18] : memref<1x4x396xf32, #tpu.memory_space<vmem>>, vector<1x4x324xf32>
    %6 = vector.shape_cast %5 : vector<1x4x324xf32> to vector<4x324xf32>
    %c1 = arith.constant 1 : index
    %c0_6 = arith.constant 0 : index
    %c0_7 = arith.constant 0 : index
    %7 = vector.load %arg2[%c1, %c0_6, %c0_7] : memref<9x128x4xf32, #tpu.memory_space<vmem>>, vector<1x128x4xf32>
    %8 = vector.shape_cast %7 : vector<1x128x4xf32> to vector<128x4xf32>
    %cst_8 = arith.constant dense<0.000000e+00> : vector<128x324xf32>
    %9 = tpu.matmul %8, %6, %cst_8 {dimension_numbers = #tpu.dot_dimension_numbers<[1], [0], [0], [1], [0, 0, 1, 1], [], []>} : vector<128x4xf32>, vector<4x324xf32>, vector<128x324xf32> -> vector<128x324xf32>
    %10 = arith.addf %4, %9 : vector<128x324xf32>
    %c0_9 = arith.constant 0 : index
    %c0_10 = arith.constant 0 : index
    %c19 = arith.constant 19 : index
    %11 = vector.load %arg1[%c0_9, %c0_10, %c19] : memref<1x4x396xf32, #tpu.memory_space<vmem>>, vector<1x4x324xf32>
    %12 = vector.shape_cast %11 : vector<1x4x324xf32> to vector<4x324xf32>
    %c2 = arith.constant 2 : index
    %c0_11 = arith.constant 0 : index
    %c0_12 = arith.constant 0 : index
    %13 = vector.load %arg2[%c2, %c0_11, %c0_12] : memref<9x128x4xf32, #tpu.memory_space<vmem>>, vector<1x128x4xf32>
    %14 = vector.shape_cast %13 : vector<1x128x4xf32> to vector<128x4xf32>
    %cst_13 = arith.constant dense<0.000000e+00> : vector<128x324xf32>
    %15 = tpu.matmul %14, %12, %cst_13 {dimension_numbers = #tpu.dot_dimension_numbers<[1], [0], [0], [1], [0, 0, 1, 1], [], []>} : vector<128x4xf32>, vector<4x324xf32>, vector<128x324xf32> -> vector<128x324xf32>
    %16 = arith.addf %10, %15 : vector<128x324xf32>
    %c0_14 = arith.constant 0 : index
    %c0_15 = arith.constant 0 : index
    %c35 = arith.constant 35 : index
    %17 = vector.load %arg1[%c0_14, %c0_15, %c35] : memref<1x4x396xf32, #tpu.memory_space<vmem>>, vector<1x4x324xf32>
    %18 = vector.shape_cast %17 : vector<1x4x324xf32> to vector<4x324xf32>
    %c3 = arith.constant 3 : index
    %c0_16 = arith.constant 0 : index
    %c0_17 = arith.constant 0 : index
    %19 = vector.load %arg2[%c3, %c0_16, %c0_17] : memref<9x128x4xf32, #tpu.memory_space<vmem>>, vector<1x128x4xf32>
    %20 = vector.shape_cast %19 : vector<1x128x4xf32> to vector<128x4xf32>
    %cst_18 = arith.constant dense<0.000000e+00> : vector<128x324xf32>
    %21 = tpu.matmul %20, %18, %cst_18 {dimension_numbers = #tpu.dot_dimension_numbers<[1], [0], [0], [1], [0, 0, 1, 1], [], []>} : vector<128x4xf32>, vector<4x324xf32>, vector<128x324xf32> -> vector<128x324xf32>
    %22 = arith.addf %16, %21 : vector<128x324xf32>
    %c0_19 = arith.constant 0 : index
    %c0_20 = arith.constant 0 : index
    %c36 = arith.constant 36 : index
    %23 = vector.load %arg1[%c0_19, %c0_20, %c36] : memref<1x4x396xf32, #tpu.memory_space<vmem>>, vector<1x4x324xf32>
    %24 = vector.shape_cast %23 : vector<1x4x324xf32> to vector<4x324xf32>
    %c4 = arith.constant 4 : index
    %c0_21 = arith.constant 0 : index
    %c0_22 = arith.constant 0 : index
    %25 = vector.load %arg2[%c4, %c0_21, %c0_22] : memref<9x128x4xf32, #tpu.memory_space<vmem>>, vector<1x128x4xf32>
    %26 = vector.shape_cast %25 : vector<1x128x4xf32> to vector<128x4xf32>
    %cst_23 = arith.constant dense<0.000000e+00> : vector<128x324xf32>
    %27 = tpu.matmul %26, %24, %cst_23 {dimension_numbers = #tpu.dot_dimension_numbers<[1], [0], [0], [1], [0, 0, 1, 1], [], []>} : vector<128x4xf32>, vector<4x324xf32>, vector<128x324xf32> -> vector<128x324xf32>
    %28 = arith.addf %22, %27 : vector<128x324xf32>
    %c0_24 = arith.constant 0 : index
    %c0_25 = arith.constant 0 : index
    %c37 = arith.constant 37 : index
    %29 = vector.load %arg1[%c0_24, %c0_25, %c37] : memref<1x4x396xf32, #tpu.memory_space<vmem>>, vector<1x4x324xf32>
    %30 = vector.shape_cast %29 : vector<1x4x324xf32> to vector<4x324xf32>
    %c5 = arith.constant 5 : index
    %c0_26 = arith.constant 0 : index
    %c0_27 = arith.constant 0 : index
    %31 = vector.load %arg2[%c5, %c0_26, %c0_27] : memref<9x128x4xf32, #tpu.memory_space<vmem>>, vector<1x128x4xf32>
    %32 = vector.shape_cast %31 : vector<1x128x4xf32> to vector<128x4xf32>
    %cst_28 = arith.constant dense<0.000000e+00> : vector<128x324xf32>
    %33 = tpu.matmul %32, %30, %cst_28 {dimension_numbers = #tpu.dot_dimension_numbers<[1], [0], [0], [1], [0, 0, 1, 1], [], []>} : vector<128x4xf32>, vector<4x324xf32>, vector<128x324xf32> -> vector<128x324xf32>
    %34 = arith.addf %28, %33 : vector<128x324xf32>
    %c0_29 = arith.constant 0 : index
    %c0_30 = arith.constant 0 : index
    %c53 = arith.constant 53 : index
    %35 = vector.load %arg1[%c0_29, %c0_30, %c53] : memref<1x4x396xf32, #tpu.memory_space<vmem>>, vector<1x4x324xf32>
    %36 = vector.shape_cast %35 : vector<1x4x324xf32> to vector<4x324xf32>
    %c6 = arith.constant 6 : index
    %c0_31 = arith.constant 0 : index
    %c0_32 = arith.constant 0 : index
    %37 = vector.load %arg2[%c6, %c0_31, %c0_32] : memref<9x128x4xf32, #tpu.memory_space<vmem>>, vector<1x128x4xf32>
    %38 = vector.shape_cast %37 : vector<1x128x4xf32> to vector<128x4xf32>
    %cst_33 = arith.constant dense<0.000000e+00> : vector<128x324xf32>
    %39 = tpu.matmul %38, %36, %cst_33 {dimension_numbers = #tpu.dot_dimension_numbers<[1], [0], [0], [1], [0, 0, 1, 1], [], []>} : vector<128x4xf32>, vector<4x324xf32>, vector<128x324xf32> -> vector<128x324xf32>
    %40 = arith.addf %34, %39 : vector<128x324xf32>
    %c0_34 = arith.constant 0 : index
    %c0_35 = arith.constant 0 : index
    %c54 = arith.constant 54 : index
    %41 = vector.load %arg1[%c0_34, %c0_35, %c54] : memref<1x4x396xf32, #tpu.memory_space<vmem>>, vector<1x4x324xf32>
    %42 = vector.shape_cast %41 : vector<1x4x324xf32> to vector<4x324xf32>
    %c7 = arith.constant 7 : index
    %c0_36 = arith.constant 0 : index
    %c0_37 = arith.constant 0 : index
    %43 = vector.load %arg2[%c7, %c0_36, %c0_37] : memref<9x128x4xf32, #tpu.memory_space<vmem>>, vector<1x128x4xf32>
    %44 = vector.shape_cast %43 : vector<1x128x4xf32> to vector<128x4xf32>
    %cst_38 = arith.constant dense<0.000000e+00> : vector<128x324xf32>
    %45 = tpu.matmul %44, %42, %cst_38 {dimension_numbers = #tpu.dot_dimension_numbers<[1], [0], [0], [1], [0, 0, 1, 1], [], []>} : vector<128x4xf32>, vector<4x324xf32>, vector<128x324xf32> -> vector<128x324xf32>
    %46 = arith.addf %40, %45 : vector<128x324xf32>
    %c0_39 = arith.constant 0 : index
    %c0_40 = arith.constant 0 : index
    %c55 = arith.constant 55 : index
    %47 = vector.load %arg1[%c0_39, %c0_40, %c55] : memref<1x4x396xf32, #tpu.memory_space<vmem>>, vector<1x4x324xf32>
    %48 = vector.shape_cast %47 : vector<1x4x324xf32> to vector<4x324xf32>
    %c8 = arith.constant 8 : index
    %c0_41 = arith.constant 0 : index
    %c0_42 = arith.constant 0 : index
    %49 = vector.load %arg2[%c8, %c0_41, %c0_42] : memref<9x128x4xf32, #tpu.memory_space<vmem>>, vector<1x128x4xf32>
    %50 = vector.shape_cast %49 : vector<1x128x4xf32> to vector<128x4xf32>
    %cst_43 = arith.constant dense<0.000000e+00> : vector<128x324xf32>
    %51 = tpu.matmul %50, %48, %cst_43 {dimension_numbers = #tpu.dot_dimension_numbers<[1], [0], [0], [1], [0, 0, 1, 1], [], []>} : vector<128x4xf32>, vector<4x324xf32>, vector<128x324xf32> -> vector<128x324xf32>
    %52 = arith.addf %46, %51 : vector<128x324xf32>
    %c0_44 = arith.constant 0 : index
    %c0_45 = arith.constant 0 : index
    %53 = vector.load %arg3[%c0_44, %c0_45] : memref<128x1xf32, #tpu.memory_space<vmem>>, vector<128x1xf32>
    %54 = vector.broadcast %53 : vector<128x1xf32> to vector<128x324xf32>
    %55 = arith.addf %52, %54 : vector<128x324xf32>
    %cst_46 = arith.constant 0.000000e+00 : f32
    %56 = vector.broadcast %cst_46 : f32 to vector<128x324xf32>
    %57 = arith.maximumf %55, %56 : vector<128x324xf32>
    %58 = vector.extract_strided_slice %57 {offsets = [0, 0], sizes = [32, 324], strides = [1, 1]} : vector<128x324xf32> to vector<32x324xf32>
    %c0_47 = arith.constant 0 : index
    %c0_48 = arith.constant 0 : index
    %c0_49 = arith.constant 0 : index
    %59 = vector.load %arg7[%c0_47, %c0_48, %c0_49] : memref<1x32x324xf32, #tpu.memory_space<vmem>>, vector<1x32x324xf32>
    %60 = vector.shape_cast %59 : vector<1x32x324xf32> to vector<32x324xf32>
    %61 = vector.shape_cast %58 : vector<32x324xf32> to vector<1x32x324xf32>
    tpu.vector_store %arg7[%c0_47, %c0_48, %c0_49], %61 {strides = array<i32>} : memref<1x32x324xf32, #tpu.memory_space<vmem>>, vector<1x32x324xf32>,
    %c0_50 = arith.constant 0 : index
    %c0_51 = arith.constant 0 : index
    %62 = vector.load %arg6[%c0_50, %c0_51] : memref<324x1xf32, #tpu.memory_space<vmem>>, vector<324x1xf32>
    %cst_52 = arith.constant dense<0.000000e+00> : vector<128x1xf32>
    %63 = tpu.matmul %57, %62, %cst_52 {dimension_numbers = #tpu.dot_dimension_numbers<[1], [0], [0], [1], [0, 0, 1, 1], [], []>} : vector<128x324xf32>, vector<324x1xf32>, vector<128x1xf32> -> vector<128x1xf32>
    %c0_53 = arith.constant 0 : index
    %c0_54 = arith.constant 0 : index
    %64 = vector.load %arg4[%c0_53, %c0_54] : memref<128x128xf32, #tpu.memory_space<vmem>>, vector<128x128xf32>
    %cst_55 = arith.constant dense<0.000000e+00> : vector<128x1xf32>
    %65 = tpu.matmul %64, %63, %cst_55 {dimension_numbers = #tpu.dot_dimension_numbers<[1], [0], [0], [1], [0, 0, 1, 1], [], []>} : vector<128x128xf32>, vector<128x1xf32>, vector<128x1xf32> -> vector<128x1xf32>
    %c0_56 = arith.constant 0 : index
    %c0_57 = arith.constant 0 : index
    %66 = vector.load %arg5[%c0_56, %c0_57] : memref<128x1xf32, #tpu.memory_space<vmem>>, vector<128x1xf32>
    %67 = arith.addf %65, %66 : vector<128x1xf32>
    %c0_58 = arith.constant 0 : index
    %c0_59 = arith.constant 0 : index
    %c0_60 = arith.constant 0 : index
    %68 = vector.load %arg8[%c0_58, %c0_59, %c0_60] : memref<1x128x1xf32, #tpu.memory_space<vmem>>, vector<1x128x1xf32>
    %69 = vector.shape_cast %68 : vector<1x128x1xf32> to vector<128x1xf32>
    %70 = vector.shape_cast %67 : vector<128x1xf32> to vector<1x128x1xf32>
    tpu.vector_store %arg8[%c0_58, %c0_59, %c0_60], %70 {strides = array<i32>} : memref<1x128x1xf32, #tpu.memory_space<vmem>>, vector<1x128x1xf32>,
    return
  }
  func.func @transform_0(%arg0: i32) -> (i32, i32, i32) {
    %c0_i32 = arith.constant 0 : i32
    %c0_i32_0 = arith.constant 0 : i32
    %c0_i32_1 = arith.constant 0 : i32
    return %arg0, %c0_i32, %c0_i32_0 : i32, i32, i32
  }
  func.func @transform_1(%arg0: i32) -> (i32, i32, i32) {
    %c0_i32 = arith.constant 0 : i32
    %c0_i32_0 = arith.constant 0 : i32
    %c0_i32_1 = arith.constant 0 : i32
    %c0_i32_2 = arith.constant 0 : i32
    return %c0_i32, %c0_i32_0, %c0_i32_1 : i32, i32, i32
  }
  func.func @transform_2(%arg0: i32) -> (i32, i32) {
    %c0_i32 = arith.constant 0 : i32
    %c0_i32_0 = arith.constant 0 : i32
    %c0_i32_1 = arith.constant 0 : i32
    return %c0_i32, %c0_i32_0 : i32, i32
  }
  func.func @transform_3(%arg0: i32) -> (i32, i32) {
    %c0_i32 = arith.constant 0 : i32
    %c0_i32_0 = arith.constant 0 : i32
    %c0_i32_1 = arith.constant 0 : i32
    return %c0_i32, %c0_i32_0 : i32, i32
  }
  func.func @transform_4(%arg0: i32) -> (i32, i32) {
    %c0_i32 = arith.constant 0 : i32
    %c0_i32_0 = arith.constant 0 : i32
    %c0_i32_1 = arith.constant 0 : i32
    return %c0_i32, %c0_i32_0 : i32, i32
  }
  func.func @transform_5(%arg0: i32) -> (i32, i32) {
    %c0_i32 = arith.constant 0 : i32
    %c0_i32_0 = arith.constant 0 : i32
    %c0_i32_1 = arith.constant 0 : i32
    return %c0_i32, %c0_i32_0 : i32, i32
  }
  func.func @transform_6(%arg0: i32) -> (i32, i32, i32) {
    %c0_i32 = arith.constant 0 : i32
    %c0_i32_0 = arith.constant 0 : i32
    %c0_i32_1 = arith.constant 0 : i32
    return %arg0, %c0_i32, %c0_i32_0 : i32, i32, i32
  }
  func.func @transform_7(%arg0: i32) -> (i32, i32, i32) {
    %c0_i32 = arith.constant 0 : i32
    %c0_i32_0 = arith.constant 0 : i32
    %c0_i32_1 = arith.constant 0 : i32
    return %arg0, %c0_i32, %c0_i32_0 : i32, i32, i32
  }
}

</mosaic_0001>

<bundles_post_ra>
// kernel: gradcam_forward.1
= control target key start
LH: loop header
LB: loop body
LE: loop exit
PB: predicated region body
PF: predicated region fallthrough
CT: control target
= control target key end

     0   :  { %s6656_s24 = smov 0   ;;  %s8665_s0 = inlined_call_operand.vmem [shape: f32[2,4,396], index: 0, kind: input, shape index: {}]   ;;  %s8666_s1 = inlined_call_operand.vmem [shape: f32[9,128,4], index: 1, kind: input, shape index: {}]   ;;  %s8667_s2 = inlined_call_operand.vmem [shape: f32[128,1], index: 2, kind: input, shape index: {}]   ;;  %s8668_s3 = inlined_call_operand.vmem [shape: f32[128,128], index: 3, kind: input, shape index: {}]   ;;  %s8669_s4 = inlined_call_operand.vmem [shape: f32[128,1], index: 4, kind: input, shape index: {}]   ;;  %s8670_s5 = inlined_call_operand.vmem [shape: f32[324,1], index: 5, kind: input, shape index: {}]   ;;  %s8671_s6 = inlined_call_operand.vmem [shape: f32[2,32,324], index: 6, kind: output, shape index: {0}]   ;;  %s8672_s7 = inlined_call_operand.vmem [shape: f32[2,128,1], index: 7, kind: output, shape index: {1}]  }
   0x1 LB: > { %s5012_s25 = sadd.s32 4294967295, %s6603_s24   ;;  %p5016_p0 = scmp.ge.s32.totalorder %s6603_s24, 1  ;;  %s6603_s24 = sphi %s6656_s24, %s18_s24  }
   0x2   : > { %p240_p1 = scmp.lt.s32.totalorder %s6603_s24, 3 }
   0x4   : > { %p241_p2 = pnand %p5016_p0, %p240_p1 }
   0x6   : > { %244 = sbr.rel (%p241_p2) target bundleno = 1353 (0x549), region = 44 }
   0xd   : > { %p277_p3 = scmp.lt.s32.totalorder %s5012_s25, 1  ;;  %v6605_v0 = vmov 0.0   ;;  %s6606_s30 = smov 111   ;;  %vm388_vm0 = vcmask 1043456   ;;  %vm707_vm1 = vcmask 908288   ;;  %vm1098_vm2 = vcmask 891904  }
   0xe   : > { %828 = vmatprep.mubr.f32.mxu0 %v6605_v0  ;;  %459 = vmatprep.mubr.f32.mxu1 %v6605_v0  ;;  %s6607_s8 = smov 109   ;;  %s6608_s9 = smov 93   ;;  %v6707_v14 = vld [vmem:[%s8666_s1] sm:$0xff]  ;;  %vm339_vm3 = vcmask 31744   ;;  %v6723_v20 = vld [vmem:[%s8666_s1 + $0x8] sm:$0xff]  ;;  %vm1537_vm4 = vcmask 760832  }
   0xf   : > { %s8684_s25 = smov (!%p277_p3, %s5012_s25), 1  ;;  %s6609_s10 = smov 110   ;;  %v6737_v23 = vld [vmem:[%s8666_s1 + $0x10] sm:$0xff]  ;;  %v6751_v27 = vld [vmem:[%s8666_s1 + $0x18] sm:$0xff]  ;;  %vm336_vm5 = vcmask 900096   ;;  %v6759_v32 = vld [vmem:[%s8666_s1 + $0x80] sm:$0xff] }
  0x10   : > { %s5484_s26 = sshll.u32 %s8684_s25, 4  ;;  %s6610_s11 = smov 92   ;;  %v6765_v33 = vld [vmem:[%s8666_s1 + $0x20] sm:$0xff]  ;;  %v6777_v34 = vld [vmem:[%s8666_s1 + $0x88] sm:$0xff]  ;;  %v6795_v36 = vld [vmem:[%s8666_s1 + $0x90] sm:$0xff]  ;;  %vm1976_vm6 = vcmask 752640  }
  0x11   : > { %s6672_s29 = scalar_lea.vmem %s8665_s0, %s5484_s26  ;;  %s6611_s12 = smov 91   ;;  %v6784_v35 = vld [vmem:[%s8666_s1 + $0x28] sm:$0xff]  ;;  %v6801_v37 = vld [vmem:[%s8666_s1 + $0x30] sm:$0xff]  ;;  %v6811_v38 = vld [vmem:[%s8666_s1 + $0x98] sm:$0xff]  ;;  %vm2415_vm7 = vcmask 744448   ;;  %vm2854_vm8 = vcmask 613376  }
  0x12   : > { %v6675_v1 = vld [vmem:[%s6672_s29] sm:$0xff]  ;;  %v293_v3 = vld [vmem:[%s6672_s29 + $0x8] sm:$0xf]  ;;  %s6612_s13 = smov 75   ;;  %v6817_v39 = vld [vmem:[%s8666_s1 + $0x38] sm:$0xff]  ;;  %s6613_s28 = smov 74  }
  0x13   : > { %701 = vrot.lane.b32.xlu1 %v6675_v1, %s6606_s30  ;;  %v6680_v2 = vcombine.high %v6675_v1, %v6675_v1  ;;  %v1071_v4 = vld [vmem:[%s6672_s29 + $0x8] sm:$0xf]  ;;  %v6827_v40 = vld [vmem:[%s8666_s1 + $0xa0] sm:$0xff]  ;;  %v6859_v44 = vld [vmem:[%s8666_s1 + $0xb0] sm:$0xff]  ;;  %s6614_s23 = smov 73   ;;  %vm3293_vm9 = vcmask 605184  }
  0x14   : > { %v1510_v5 = vld [vmem:[%s6672_s29 + $0x8] sm:$0xf]  ;;  %v6833_v41 = vld [vmem:[%s8666_s1 + $0x40] sm:$0xff]  ;;  %v6865_v45 = vld [vmem:[%s8666_s1 + $0x50] sm:$0xff]  ;;  %vm3732_vm10 = vcmask 596992   ;;  %vm4337_vm11 = vcmask 556032  }
  0x15   : > { %703 = vrot.lane.b32.xlu0 %v6680_v2, %s6606_s30  ;;  %v1949_v6 = vld [vmem:[%s6672_s29 + $0x8] sm:$0xf]  ;;  %v6875_v46 = vld [vmem:[%s8666_s1 + $0xb8] sm:$0xff]  ;;  %v6891_v48 = vld [vmem:[%s8666_s1 + $0xc0] sm:$0xff]  ;;  %s5485_s17 = sshll.u32 %s8684_s25, 7  ;;  %vm4907_vm12 = vcmask 7168  }
  0x16   : > { %v2388_v7 = vld [vmem:[%s6672_s29 + $0x8] sm:$0xf]  ;;  %v6881_v47 = vld [vmem:[%s8666_s1 + $0x58] sm:$0xff]  ;;  %v6899_v50 = vld [vmem:[%s8666_s1 + $0x100] sm:$0xff] }
  0x17   : > { %1094 = vrot.lane.b32.xlu1 %v6680_v2, %s6607_s8  ;;  %v2827_v10 = vld [vmem:[%s6672_s29 + $0x8] sm:$0xf]  ;;  %v6935_v56 = vld [vmem:[%s8666_s1 + $0xd0] sm:$0xff]  ;;  %v5033_v58 = vld [vmem:[%s8666_s1 + $0xd8] sm:$0xff] }
  0x18   : > { %v6843_v42 = vld [vmem:[%s8666_s1 + $0xa8] sm:$0xff]  ;;  %v6941_v57 = vld [vmem:[%s8666_s1 + $0x110] sm:$0xff]  ;;  %v6957_v60 = vld [vmem:[%s8666_s1 + $0x118] sm:$0xff] }
  0x19   : > { %705 = vrot.lane.b32.xlu0 %v293_v3, %s6606_s30  ;;  %v6849_v43 = vld [vmem:[%s8666_s1 + $0x48] sm:$0xff]  ;;  %v5034_v61 = vld [vmem:[%s8666_s1 + $0xe0] sm:$0xff] }
  0x1a   : > { %v6917_v54 = vld [vmem:[%s8666_s1 + $0xc8] sm:$0xff]  ;;  %v6971_v62 = vld [vmem:[%s8666_s1 + $0x120] sm:$0xff] }
  0x1b   : > { %1092 = vrot.lane.b32.xlu1 %v6675_v1, %s6607_s8  ;;  %v6924_v55 = vld [vmem:[%s8666_s1 + $0x108] sm:$0xff] }
  0x1c   : > { %v3266_v59 = vld [vmem:[%s6672_s29 + $0x8] sm:$0xf] }
  0x1d   : > { %1096 = vrot.lane.b32.xlu0 %v1071_v4, %s6607_s8  ;;  %v5035_v63 = vld [vmem:[%s8666_s1 + $0xe8] sm:$0xff]  ;;  %v5036_v4 = vld [vmem:[%s8666_s1 + $0xf0] sm:$0xff] }
  0x1f   : > { %1535 = vrot.lane.b32.xlu1 %v1510_v5, %s6608_s9  ;;  %v6997_v5 = vld [vmem:[%s8666_s1 + $0x130] sm:$0xff] }
  0x21   : > { %1533 = vrot.lane.b32.xlu0 %v6680_v2, %s6608_s9 }
  0x23   : > { %332 = vrot.lane.b32.xlu1 %v6680_v2, %s6609_s10 }
  0x25   : > { %1531 = vrot.lane.b32.xlu0 %v6675_v1, %s6608_s9  ;;  %s6574_s9 = smul.u32 96, %s8684_s25 }
  0x27   : > { %330 = vrot.lane.b32.xlu1 %v6675_v1, %s6609_s10 }
  0x29   : > { %334 = vrot.lane.b32.xlu0 %v293_v3, %s6609_s10  ;;  %v6984_v3 = vld [vmem:[%s8666_s1 + $0x128] sm:$0xff] }
  0x2b   : > { %1974 = vrot.lane.b32.xlu1 %v1949_v6, %s6610_s11  ;;  %v5037_v6 = vld [vmem:[%s8666_s1 + $0xf8] sm:$0xff] }
  0x2d   : > { %1972 = vrot.lane.b32.xlu0 %v6680_v2, %s6610_s11 }
  0x2f   : > { %2411 = vrot.lane.b32.xlu1 %v6680_v2, %s6611_s12 }
  0x31   : > { %1970 = vrot.lane.b32.xlu0 %v6675_v1, %s6610_s11 }
  0x33   : > { %2409 = vrot.lane.b32.xlu1 %v6675_v1, %s6611_s12 }
  0x35   : > { %2413 = vrot.lane.b32.xlu0 %v2388_v7, %s6611_s12  ;;  %v7010_v7 = vld [vmem:[%s8666_s1 + $0x138] sm:$0xff]  ;;  %s8323_s12 = scalar_lea.vmem %s8671_s6, %s6574_s9 }
  0x37   : > { %2852 = vrot.lane.b32.xlu1 %v2827_v10, %s6612_s13  ;;  %v7049_v10 = vld [vmem:[%s8666_s1 + $0x150] sm:$0xff] }
  0x39   : > { %2850 = vrot.lane.b32.xlu0 %v6680_v2, %s6612_s13 }
  0x3b   : > { %3289 = vrot.lane.b32.xlu1 %v6680_v2, %s6613_s28 }
  0x3d   : > { %2848 = vrot.lane.b32.xlu0 %v6675_v1, %s6612_s13 }
  0x3f   : > { %3287 = vrot.lane.b32.xlu1 %v6675_v1, %s6613_s28 }
  0x41   : > { %3291 = vrot.lane.b32.xlu0 %v3266_v59, %s6613_s28  ;;  %v5224_v59 = vld [vmem:[%s8666_s1 + $0x270] sm:$0xff] }
  0x45   : > { %3728 = vrot.lane.b32.xlu0 %v6680_v2, %s6614_s23 }
  0x49   : > { %3726 = vrot.lane.b32.xlu0 %v6675_v1, %s6614_s23  ;;  %v7149_v1 = vld [vmem:[%s8666_s1 + $0x188] sm:$0xff] }
  0x85   : > { %v702_v8 = vpop.permute.xlu1 %701 }
  0x87   : > { %v704_v9 = vpop.permute.xlu0 %703 }
  0x88   : > { %v6710_v16 = vsel %vm707_vm1, %v702_v8, %v704_v9  ;;  %v7021_v8 = vld [vmem:[%s8666_s1 + $0x140] sm:$0xff] }
  0x89   : > { %v1095_v11 = vpop.permute.xlu1 %1094 }
  0x8b   : > { %v6701_v12 = vpop.permute.xlu0 %705 }
  0x8c   : > { %v709_v13 = vsel %vm707_vm1, %v704_v9, %v6701_v12  ;;  %v7036_v9 = vld [vmem:[%s8666_s1 + $0x148] sm:$0xff] }
  0x8d   : > { %v1093_v15 = vpop.permute.xlu1 %1092  ;;  %5073 = vmatprep.subr.msk.mxu0 %vm388_vm0, %v709_v13 }
  0x8e   : > { %5074 = vmatpush1.msk.msra.mxu0 %vm388_vm0, %v6710_v16  ;;  %v1099_v17 = vsel %vm1098_vm2, %v1093_v15, %v1095_v11  ;;  %v7085_v15 = vld [vmem:[%s8666_s1 + $0x168] sm:$0xff] }
  0x8f   : > { %5075 = vmatmul.mubr.msk.f32.vlgmr.msra.gmra.mrb[0].mxu0 %vm339_vm3, %v6707_v14  ;;  %v6716_v18 = vpop.permute.xlu0 %1096 }
  0x90   : > { %v1100_v19 = vsel %vm1098_vm2, %v1095_v11, %v6716_v18  ;;  %834 = vmatprep.mubr.f32.mxu0 %v6605_v0  ;;  %v7061_v11 = vld [vmem:[%s8666_s1 + $0x158] sm:$0xff] }
  0x91   : > { %5124 = vmatprep.subr.msk.mxu0 %vm388_vm0, %v1100_v19  ;;  %v6726_v21 = vpop.permute.xlu1 %1535  ;;  %v7106_v19 = vld [vmem:[%s8666_s1 + $0x178] sm:$0xff] }
  0x92   : > { %5125 = vmatpush1.msk.msra.mxu0 %vm388_vm0, %v1099_v17  ;;  %v3705_v17 = vld [vmem:[%s6672_s29 + $0x8] sm:$0xf]  ;;  %s8586_s29 = scalar_lea.vmem %s8672_s7, %s5485_s17 }
  0x93   : > { %5076 = vmatmul.mubr.msk.f32.gmra.mrb[2].mxu0 %vm339_vm3, %v6723_v20  ;;  %v6731_v22 = vpop.permute.xlu0 %1533  ;;  %3730 = vrot.lane.b32.xlu1 %v3705_v17, %s6614_s23 }
  0x94   : > { %840 = vmatprep.mubr.f32.mxu0 %v6605_v0  ;;  %v1539_v24 = vsel %vm1537_vm4, %v6731_v22, %v6726_v21 }
  0x95   : > { %v333_v25 = vpop.permute.xlu1 %332  ;;  %5175 = vmatprep.subr.msk.mxu0 %vm388_vm0, %v1539_v24  ;;  %v7116_v24 = vld [vmem:[%s8666_s1 + $0x60] sm:$0xff] }
  0x97   : > { %5077 = vmatmul.mubr.msk.f32.gmra.mrb[4].mxu0 %vm339_vm3, %v6737_v23  ;;  %v6745_v26 = vpop.permute.xlu0 %1531 }
  0x98   : > { %846 = vmatprep.mubr.f32.mxu0 %v6605_v0  ;;  %v1538_v51 = vsel %vm1537_vm4, %v6745_v26, %v6731_v22 }
  0x99   : > { %v331_v28 = vpop.permute.xlu1 %330 }
  0x9a   : > { %v337_v30 = vsel %vm336_vm5, %v331_v28, %v333_v25 }
  0x9b   : > { %5078 = vmatmul.mubr.msk.f32.gmra.mrb[6].mxu0 %vm339_vm3, %v6751_v27  ;;  %v335_v29 = vpop.permute.xlu0 %334 }
  0x9c   : > { %v338_v31 = vsel %vm336_vm5, %v333_v25, %v335_v29  ;;  %852 = vmatprep.mubr.f32.mxu0 %v6605_v0  ;;  %v7122_v25 = vld [vmem:[%s8666_s1 + $0x180] sm:$0xff] }
  0x9d   : > { %5038 = vmatprep.subr.msk.mxu1 %vm388_vm0, %v338_v31  ;;  %v6893_v49 = vpop.permute.xlu1 %1974  ;;  %v7165_v31 = vld [vmem:[%s8666_s1 + $0x190] sm:$0xff] }
  0x9e   : > { %5039 = vmatpush1.msk.msra.mxu1 %vm388_vm0, %v337_v30 }
  0x9f   : > { %5040 = vmatmul.mubr.msk.f32.vlgmr.msra.gmra.mrb[0].mxu1 %vm339_vm3, %v6759_v32  ;;  %5776 = vmatprep.subr.msk.mxu1 %vm388_vm0, %v335_v29  ;;  %v6904_v52 = vpop.permute.xlu0 %1972 }
  0xa0   : > { %5079 = vmatmul.mubr.msk.f32.gmra.mrb[8].mxu0 %vm339_vm3, %v6765_v33  ;;  %5777 = vmatpush3.msk.msra.mxu1 %vm388_vm0, %v335_v29  ;;  %v1978_v53 = vsel %vm1976_vm6, %v6904_v52, %v6893_v49  ;;  %v307_v29 = vld [vmem:[%s8666_s1 + $0x68] sm:$0xff] }
  0xa1   : > { %6188 = vmatprep.subr.msk.mxu1 %vm388_vm0, %v709_v13  ;;  %465 = vmatprep.mubr.f32.mxu1 %v6605_v0  ;;  %v7073_v13 = vld [vmem:[%s8666_s1 + $0x160] sm:$0xff]  ;;  %v7131_v28 = vpop.permute.xlu1 %2411 }
  0xa2   : > { %858 = vmatprep.mubr.f32.mxu0 %v6605_v0 }
  0xa3   : > { %5041 = vmatmul.mubr.msk.f32.gmra.mrb[2].mxu1 %vm339_vm3, %v6777_v34  ;;  %v1971_v22 = vpop.permute.xlu0 %1970 }
  0xa4   : > { %5080 = vmatmul.mubr.msk.f32.gmra.mrb[10].mxu0 %vm339_vm3, %v6784_v35  ;;  %471 = vmatprep.mubr.f32.mxu1 %v6605_v0  ;;  %v1977_v26 = vsel %vm1976_vm6, %v1971_v22, %v6904_v52  ;;  %v5217_v52 = vld [vmem:[%s8666_s1 + $0x238] sm:$0xff]  ;;  %v5266_v22 = vld [vmem:[%s8666_s1 + $0x2a8] sm:$0xff] }
  0xa5   : > { %864 = vmatprep.mubr.f32.mxu0 %v6605_v0 }
  0xa7   : > { %5042 = vmatmul.mubr.msk.f32.gmra.mrb[4].mxu1 %vm339_vm3, %v6795_v36  ;;  %v7124_v2 = vpop.permute.xlu0 %2413 }
  0xa8   : > { %5081 = vmatmul.mubr.msk.f32.gmra.mrb[12].mxu0 %vm339_vm3, %v6801_v37  ;;  %477 = vmatprep.mubr.f32.mxu1 %v6605_v0  ;;  %v2417_v30 = vsel %vm2415_vm7, %v7131_v28, %v7124_v2 }
  0xa9   : > { %870 = vmatprep.mubr.f32.mxu0 %v6605_v0 }
  0xab   : > { %5043 = vmatmul.mubr.msk.f32.gmra.mrb[6].mxu1 %vm339_vm3, %v6811_v38 }
  0xac   : > { %5082 = vmatmul.mubr.msk.f32.gmra.mrb[14].mxu0 %vm339_vm3, %v6817_v39  ;;  %483 = vmatprep.mubr.f32.mxu1 %v6605_v0 }
  0xad   : > { %876 = vmatprep.mubr.f32.mxu0 %v6605_v0 }
  0xaf   : > { %5044 = vmatmul.mubr.msk.f32.gmra.mrb[8].mxu1 %vm339_vm3, %v6827_v40 }
  0xb0   : > { %5083 = vmatmul.mubr.msk.f32.gmra.mrb[16].mxu0 %vm339_vm3, %v6833_v41  ;;  %489 = vmatprep.mubr.f32.mxu1 %v6605_v0 }
  0xb1   : > { %882 = vmatprep.mubr.f32.mxu0 %v6605_v0 }
  0xb3   : > { %5045 = vmatmul.mubr.msk.f32.gmra.mrb[10].mxu1 %vm339_vm3, %v6843_v42 }
  0xb4   : > { %5084 = vmatmul.mubr.msk.f32.gmra.mrb[18].mxu0 %vm339_vm3, %v6849_v43  ;;  %495 = vmatprep.mubr.f32.mxu1 %v6605_v0 }
  0xb5   : > { %888 = vmatprep.mubr.f32.mxu0 %v6605_v0 }
  0xb7   : > { %5046 = vmatmul.mubr.msk.f32.gmra.mrb[12].mxu1 %vm339_vm3, %v6859_v44 }
  0xb8   : > { %5085 = vmatmul.mubr.msk.f32.gmra.mrb[20].mxu0 %vm339_vm3, %v6865_v45  ;;  %501 = vmatprep.mubr.f32.mxu1 %v6605_v0 }
  0xb9   : > { %894 = vmatprep.mubr.f32.mxu0 %v6605_v0 }
  0xbb   : > { %5047 = vmatmul.mubr.msk.f32.gmra.mrb[14].mxu1 %vm339_vm3, %v6875_v46 }
  0xbc   : > { %5086 = vmatmul.mubr.msk.f32.gmra.mrb[22].mxu0 %vm339_vm3, %v6881_v47  ;;  %507 = vmatprep.mubr.f32.mxu1 %v6605_v0 }
  0xbd   : > { %1219 = vmatprep.mubr.f32.mxu0 %v6605_v0 }
  0xbf   : > { %5048 = vmatmul.mubr.msk.f32.gmra.mrb[16].mxu1 %vm339_vm3, %v6891_v48 }
  0xc0   : > { %5126 = vmatmul.mubr.msk.f32.vlgmr.msra.gmra.mrb[0].mxu0 %vm339_vm3, %v6899_v50  ;;  %513 = vmatprep.mubr.f32.mxu1 %v6605_v0 }
  0xc1   : > { %5176 = vmatpush1.msk.msra.mxu0 %vm388_vm0, %v1538_v51  ;;  %1225 = vmatprep.mubr.f32.mxu0 %v6605_v0  ;;  %v5215_v51 = vld [vmem:[%s8666_s1 + $0x228] sm:$0xff] }
  0xc2   : > { %5226 = vmatprep.subr.msk.mxu0 %vm388_vm0, %v1978_v53  ;;  %v5218_v53 = vld [vmem:[%s8666_s1 + $0x240] sm:$0xff] }
  0xc3   : > { %5049 = vmatmul.mubr.msk.f32.gmra.mrb[18].mxu1 %vm339_vm3, %v6917_v54 }
  0xc4   : > { %5127 = vmatmul.mubr.msk.f32.gmra.mrb[2].mxu0 %vm339_vm3, %v6924_v55  ;;  %519 = vmatprep.mubr.f32.mxu1 %v6605_v0 }
  0xc5   : > { %1231 = vmatprep.mubr.f32.mxu0 %v6605_v0 }
  0xc7   : > { %5050 = vmatmul.mubr.msk.f32.gmra.mrb[20].mxu1 %vm339_vm3, %v6935_v56 }
  0xc8   : > { %5128 = vmatmul.mubr.msk.f32.gmra.mrb[4].mxu0 %vm339_vm3, %v6941_v57  ;;  %525 = vmatprep.mubr.f32.mxu1 %v6605_v0 }
  0xc9   : > { %1237 = vmatprep.mubr.f32.mxu0 %v6605_v0 }
  0xcb   : > { %5051 = vmatmul.mubr.msk.f32.gmra.mrb[22].mxu1 %vm339_vm3, %v5033_v58 }
  0xcc   : > { %5129 = vmatmul.mubr.msk.f32.gmra.mrb[6].mxu0 %vm339_vm3, %v6957_v60  ;;  %531 = vmatprep.mubr.f32.mxu1 %v6605_v0 }
  0xcd   : > { %1243 = vmatprep.mubr.f32.mxu0 %v6605_v0 }
  0xcf   : > { %5052 = vmatmul.mubr.msk.f32.gmra.mrb[24].mxu1 %vm339_vm3, %v5034_v61 }
  0xd0   : > { %5130 = vmatmul.mubr.msk.f32.gmra.mrb[8].mxu0 %vm339_vm3, %v6971_v62  ;;  %537 = vmatprep.mubr.f32.mxu1 %v6605_v0 }
  0xd1   : > { %1249 = vmatprep.mubr.f32.mxu0 %v6605_v0 }
  0xd3   : > { %5053 = vmatmul.mubr.msk.f32.gmra.mrb[26].mxu1 %vm339_vm3, %v5035_v63 }
  0xd4   : > { %5131 = vmatmul.mubr.msk.f32.gmra.mrb[10].mxu0 %vm339_vm3, %v6984_v3  ;;  %543 = vmatprep.mubr.f32.mxu1 %v6605_v0 }
  0xd5   : > { %1255 = vmatprep.mubr.f32.mxu0 %v6605_v0 }
  0xd7   : > { %5054 = vmatmul.mubr.msk.f32.gmra.mrb[28].mxu1 %vm339_vm3, %v5036_v4 }
  0xd8   : > { %5132 = vmatmul.mubr.msk.f32.gmra.mrb[12].mxu0 %vm339_vm3, %v6997_v5  ;;  %549 = vmatprep.mubr.f32.mxu1 %v6605_v0 }
  0xd9   : > { %1261 = vmatprep.mubr.f32.mxu0 %v6605_v0 }
  0xdb   : > { %5055 = vmatmul.mubr.msk.f32.gmra.mrb[30].mxu1 %vm339_vm3, %v5037_v6 }
  0xdc   : > { %5133 = vmatmul.mubr.msk.f32.gmra.mrb[14].mxu0 %vm339_vm3, %v7010_v7  ;;  %5778 = vmatprep.mubr.msk.f32.mxu1 %vm339_vm3, %v6759_v32  ;;  %v309_v32 = vld [vmem:[%s8666_s1 + $0x78] sm:$0xff] }
  0xdd   : > { %1267 = vmatprep.mubr.f32.mxu0 %v6605_v0 }
  0xdf   : > { %5779 = vmatmul.mubr.msk.f32.vlgmr.msra.gmra.mrb[32].mxu1 %vm339_vm3, %v6777_v34  ;;  %v7178_v34 = vld [vmem:[%s8666_s1 + $0x198] sm:$0xff] }
  0xe0   : > { %6189 = vmatpush1.msk.msra.mxu1 %vm388_vm0, %v6710_v16  ;;  %5134 = vmatmul.mubr.msk.f32.gmra.mrb[16].mxu0 %vm339_vm3, %v7021_v8  ;;  %v7095_v16 = vld [vmem:[%s8666_s1 + $0x170] sm:$0xff] }
  0xe1   : > { %5802 = vmatprep.subr.msk.mxu1 %vm388_vm0, %v6701_v12  ;;  %5781 = vmatprep.mubr.msk.f32.mxu1 %vm339_vm3, %v6795_v36  ;;  %v7189_v36 = vld [vmem:[%s8666_s1 + $0x1a0] sm:$0xff] }
  0xe2   : > { %1273 = vmatprep.mubr.f32.mxu0 %v6605_v0 }
  0xe3   : > { %5782 = vmatmul.mubr.msk.f32.gmra.mrb[34].mxu1 %vm339_vm3, %v6811_v38  ;;  %v7301_v38 = vld [vmem:[%s8666_s1 + $0x1e8] sm:$0xff] }
  0xe4   : > { %5135 = vmatmul.mubr.msk.f32.gmra.mrb[18].mxu0 %vm339_vm3, %v7036_v9  ;;  %5784 = vmatprep.mubr.msk.f32.mxu1 %vm339_vm3, %v6827_v40  ;;  %v2410_v40 = vpop.permute.xlu1 %2409 }
  0xe5   : > { %1279 = vmatprep.mubr.f32.mxu0 %v6605_v0 }
  0xe7   : > { %5785 = vmatmul.mubr.msk.f32.gmra.mrb[36].mxu1 %vm339_vm3, %v6843_v42  ;;  %v2416_v42 = vsel %vm2415_vm7, %v2410_v40, %v7131_v28  ;;  %v5268_v28 = vld [vmem:[%s8666_s1 + $0x2b8] sm:$0xff] }
  0xe8   : > { %5136 = vmatmul.mubr.msk.f32.gmra.mrb[20].mxu0 %vm339_vm3, %v7049_v10  ;;  %5787 = vmatprep.mubr.msk.f32.mxu1 %vm339_vm3, %v6859_v44  ;;  %v7344_v44 = vpop.permute.xlu1 %2852 }
  0xe9   : > { %1285 = vmatprep.mubr.f32.mxu0 %v6605_v0 }
  0xeb   : > { %5788 = vmatmul.mubr.msk.f32.gmra.mrb[38].mxu1 %vm339_vm3, %v6875_v46  ;;  %v5211_v46 = vld [vmem:[%s8666_s1 + $0x208] sm:$0xff] }
  0xec   : > { %5137 = vmatmul.mubr.msk.f32.gmra.mrb[22].mxu0 %vm339_vm3, %v7061_v11  ;;  %5790 = vmatprep.mubr.msk.f32.mxu1 %vm339_vm3, %v6891_v48  ;;  %v5213_v48 = vld [vmem:[%s8666_s1 + $0x218] sm:$0xff] }
  0xed   : > { %1291 = vmatprep.mubr.f32.mxu0 %v6605_v0 }
  0xef   : > { %5791 = vmatmul.mubr.msk.f32.gmra.mrb[40].mxu1 %vm339_vm3, %v6917_v54  ;;  %v5219_v54 = vld [vmem:[%s8666_s1 + $0x248] sm:$0xff] }
  0xf0   : > { %5138 = vmatmul.mubr.msk.f32.gmra.mrb[24].mxu0 %vm339_vm3, %v7073_v13  ;;  %5793 = vmatprep.mubr.msk.f32.mxu1 %vm339_vm3, %v6935_v56  ;;  %v5221_v56 = vld [vmem:[%s8666_s1 + $0x258] sm:$0xff] }
  0xf1   : > { %1297 = vmatprep.mubr.f32.mxu0 %v6605_v0 }
  0xf3   : > { %5794 = vmatmul.mubr.msk.f32.gmra.mrb[42].mxu1 %vm339_vm3, %v5033_v58  ;;  %v5223_v58 = vld [vmem:[%s8666_s1 + $0x268] sm:$0xff] }
  0xf4   : > { %5139 = vmatmul.mubr.msk.f32.gmra.mrb[26].mxu0 %vm339_vm3, %v7085_v15  ;;  %5796 = vmatprep.mubr.msk.f32.mxu1 %vm339_vm3, %v5034_v61 }
  0xf5   : > { %1303 = vmatprep.mubr.f32.mxu0 %v6605_v0 }
  0xf7   : > { %5797 = vmatmul.mubr.msk.f32.gmra.mrb[44].mxu1 %vm339_vm3, %v5035_v63 }
  0xf8   : > { %5140 = vmatmul.mubr.msk.f32.gmra.mrb[28].mxu0 %vm339_vm3, %v7095_v16  ;;  %5799 = vmatprep.mubr.msk.f32.mxu1 %vm339_vm3, %v5036_v4 }
  0xf9   : > { %1309 = vmatprep.mubr.f32.mxu0 %v6605_v0 }
  0xfb   : > { %5800 = vmatmul.mubr.msk.f32.gmra.mrb[46].mxu1 %vm339_vm3, %v5037_v6  ;;  %v5262_v6 = vld [vmem:[%s8666_s1 + $0x288] sm:$0xff] }
  0xfc   : > { %5141 = vmatmul.mubr.msk.f32.gmra.mrb[30].mxu0 %vm339_vm3, %v7106_v19  ;;  %900 = vmatprep.mubr.f32.mxu1 %v6605_v0 }
  0xfd   : > { %1658 = vmatprep.mubr.f32.mxu0 %v6605_v0 }
  0xff   : > { %5087 = vmatmul.mubr.msk.f32.vlgmr.msra.gmra.mrb[24].mxu1 %vm339_vm3, %v7116_v24 }
 0x100   : > { %5803 = vmatpush3.msk.msra.mxu1 %vm388_vm0, %v6701_v12  ;;  %5177 = vmatmul.mubr.msk.f32.vlgmr.msra.gmra.mrb[0].mxu0 %vm339_vm3, %v7122_v25  ;;  %v308_v12 = vld [vmem:[%s8666_s1 + $0x70] sm:$0xff] }
 0x101   : > { %5227 = vmatpush1.msk.msra.mxu0 %vm388_vm0, %v1977_v26  ;;  %5828 = vmatprep.subr.msk.mxu1 %vm388_vm0, %v6716_v18 }
 0x102   : > { %906 = vmatprep.mubr.f32.mxu1 %v6605_v0  ;;  %1664 = vmatprep.mubr.f32.mxu0 %v6605_v0 }
 0x103   : > { %5088 = vmatmul.mubr.msk.f32.gmra.mrb[26].mxu1 %vm339_vm3, %v307_v29  ;;  %5277 = vmatprep.subr.msk.mxu0 %vm388_vm0, %v2417_v30  ;;  %v5269_v30 = vld [vmem:[%s8666_s1 + $0x2c0] sm:$0xff] }
 0x104   : > { %5178 = vmatmul.mubr.msk.f32.gmra.mrb[2].mxu0 %vm339_vm3, %v7149_v1  ;;  %912 = vmatprep.mubr.f32.mxu1 %v6605_v0 }
 0x105   : > { %1670 = vmatprep.mubr.f32.mxu0 %v6605_v0 }
 0x107   : > { %5089 = vmatmul.mubr.msk.f32.gmra.mrb[28].mxu1 %vm339_vm3, %v308_v12 }
 0x108   : > { %5179 = vmatmul.mubr.msk.f32.gmra.mrb[4].mxu0 %vm339_vm3, %v7165_v31  ;;  %918 = vmatprep.mubr.f32.mxu1 %v6605_v0 }
 0x109   : > { %1676 = vmatprep.mubr.f32.mxu0 %v6605_v0 }
 0x10b   : > { %5090 = vmatmul.mubr.msk.f32.gmra.mrb[30].mxu1 %vm339_vm3, %v309_v32 }
 0x10c   : > { %5180 = vmatmul.mubr.msk.f32.gmra.mrb[6].mxu0 %vm339_vm3, %v7178_v34  ;;  %5804 = vmatprep.mubr.msk.f32.mxu1 %vm339_vm3, %v6707_v14  ;;  %v7204_v14 = vld [vmem:[%s8666_s1 + $0x1a8] sm:$0xff] }
 0x10d   : > { %1682 = vmatprep.mubr.f32.mxu0 %v6605_v0 }
 0x10f   : > { %5805 = vmatmul.mubr.msk.f32.vlgmr.msra.gmra.mrb[32].mxu1 %vm339_vm3, %v6723_v20  ;;  %v7229_v20 = vld [vmem:[%s8666_s1 + $0x1b8] sm:$0xff] }
 0x110   : > { %5829 = vmatpush3.msk.msra.mxu1 %vm388_vm0, %v6716_v18  ;;  %5181 = vmatmul.mubr.msk.f32.gmra.mrb[8].mxu0 %vm339_vm3, %v7189_v36  ;;  %v7217_v18 = vld [vmem:[%s8666_s1 + $0x1b0] sm:$0xff] }
 0x111   : > { %5854 = vmatprep.subr.msk.mxu1 %vm388_vm0, %v6726_v21  ;;  %5807 = vmatprep.mubr.msk.f32.mxu1 %vm339_vm3, %v6737_v23  ;;  %v7241_v23 = vld [vmem:[%s8666_s1 + $0x1c0] sm:$0xff] }
 0x112   : > { %1688 = vmatprep.mubr.f32.mxu0 %v6605_v0 }
 0x113   : > { %5808 = vmatmul.mubr.msk.f32.gmra.mrb[34].mxu1 %vm339_vm3, %v6751_v27  ;;  %v7253_v27 = vld [vmem:[%s8666_s1 + $0x1c8] sm:$0xff] }
 0x114   : > { %5182 = vmatmul.mubr.msk.f32.gmra.mrb[10].mxu0 %vm339_vm3, %v7204_v14  ;;  %5810 = vmatprep.mubr.msk.f32.mxu1 %vm339_vm3, %v6765_v33  ;;  %v7265_v33 = vld [vmem:[%s8666_s1 + $0x1d0] sm:$0xff] }
 0x115   : > { %1694 = vmatprep.mubr.f32.mxu0 %v6605_v0 }
 0x117   : > { %5811 = vmatmul.mubr.msk.f32.gmra.mrb[36].mxu1 %vm339_vm3, %v6784_v35  ;;  %v7275_v35 = vld [vmem:[%s8666_s1 + $0x1d8] sm:$0xff] }
 0x118   : > { %5183 = vmatmul.mubr.msk.f32.gmra.mrb[12].mxu0 %vm339_vm3, %v7217_v18  ;;  %5813 = vmatprep.mubr.msk.f32.mxu1 %vm339_vm3, %v6801_v37  ;;  %v7286_v37 = vld [vmem:[%s8666_s1 + $0x1e0] sm:$0xff] }
 0x119   : > { %1700 = vmatprep.mubr.f32.mxu0 %v6605_v0 }
 0x11b   : > { %5814 = vmatmul.mubr.msk.f32.gmra.mrb[38].mxu1 %vm339_vm3, %v6817_v39  ;;  %v7326_v39 = vld [vmem:[%s8666_s1 + $0x1f8] sm:$0xff] }
 0x11c   : > { %5184 = vmatmul.mubr.msk.f32.gmra.mrb[14].mxu0 %vm339_vm3, %v7229_v20  ;;  %5816 = vmatprep.mubr.msk.f32.mxu1 %vm339_vm3, %v6833_v41  ;;  %v7338_v41 = vld [vmem:[%s8666_s1 + $0x200] sm:$0xff] }
 0x11d   : > { %1706 = vmatprep.mubr.f32.mxu0 %v6605_v0 }
 0x11f   : > { %5817 = vmatmul.mubr.msk.f32.gmra.mrb[40].mxu1 %vm339_vm3, %v6849_v43  ;;  %v7342_v43 = vpop.permute.xlu0 %2850 }
 0x120   : > { %5185 = vmatmul.mubr.msk.f32.gmra.mrb[16].mxu0 %vm339_vm3, %v7241_v23  ;;  %5819 = vmatprep.mubr.msk.f32.mxu1 %vm339_vm3, %v6865_v45  ;;  %v2856_v45 = vsel %vm2854_vm8, %v7342_v43, %v7344_v44 }
 0x121   : > { %1712 = vmatprep.mubr.f32.mxu0 %v6605_v0 }
 0x123   : > { %5820 = vmatmul.mubr.msk.f32.gmra.mrb[42].mxu1 %vm339_vm3, %v6881_v47  ;;  %v5212_v47 = vld [vmem:[%s8666_s1 + $0x210] sm:$0xff]  ;;  %v2849_v61 = vpop.permute.xlu0 %2848 }
 0x124   : > { %5186 = vmatmul.mubr.msk.f32.gmra.mrb[18].mxu0 %vm339_vm3, %v7253_v27  ;;  %5822 = vmatprep.mubr.msk.f32.mxu1 %vm339_vm3, %v7116_v24  ;;  %v2855_v63 = vsel %vm2854_vm8, %v2849_v61, %v7342_v43  ;;  %v5314_v43 = vld [vmem:[%s8666_s1 + $0x310] sm:$0xff]  ;;  %v7747_v61 = vld [vmem:[%s8666_s1 + $0x358] sm:$0xff] }
 0x125   : > { %1718 = vmatprep.mubr.f32.mxu0 %v6605_v0 }
 0x127   : > { %5823 = vmatmul.mubr.msk.f32.gmra.mrb[44].mxu1 %vm339_vm3, %v307_v29  ;;  %v7500_v4 = vpop.permute.xlu0 %3291 }
 0x128   : > { %5187 = vmatmul.mubr.msk.f32.gmra.mrb[20].mxu0 %vm339_vm3, %v7265_v33  ;;  %5825 = vmatprep.mubr.msk.f32.mxu1 %vm339_vm3, %v308_v12  ;;  %v5270_v12 = vld [vmem:[%s8666_s1 + $0x2c8] sm:$0xff] }
 0x129   : > { %1724 = vmatprep.mubr.f32.mxu0 %v6605_v0 }
 0x12b   : > { %5826 = vmatmul.mubr.msk.f32.gmra.mrb[46].mxu1 %vm339_vm3, %v309_v32  ;;  %v5271_v32 = vld [vmem:[%s8666_s1 + $0x2d0] sm:$0xff] }
 0x12c   : > { %5188 = vmatmul.mubr.msk.f32.gmra.mrb[22].mxu0 %vm339_vm3, %v7275_v35  ;;  %5830 = vmatprep.mubr.msk.f32.mxu1 %vm339_vm3, %v6899_v50  ;;  %v5214_v50 = vld [vmem:[%s8666_s1 + $0x220] sm:$0xff] }
 0x12d   : > { %1730 = vmatprep.mubr.f32.mxu0 %v6605_v0 }
 0x12f   : > { %5831 = vmatmul.mubr.msk.f32.vlgmr.msra.gmra.mrb[32].mxu1 %vm339_vm3, %v6924_v55  ;;  %v5220_v55 = vld [vmem:[%s8666_s1 + $0x250] sm:$0xff] }
 0x130   : > { %5189 = vmatmul.mubr.msk.f32.gmra.mrb[24].mxu0 %vm339_vm3, %v7286_v37  ;;  %5855 = vmatpush3.msk.msra.mxu1 %vm388_vm0, %v6726_v21  ;;  %v7314_v21 = vld [vmem:[%s8666_s1 + $0x1f0] sm:$0xff] }
 0x131   : > { %5880 = vmatprep.subr.msk.mxu1 %vm388_vm0, %v6893_v49  ;;  %5833 = vmatprep.mubr.msk.f32.mxu1 %vm339_vm3, %v6941_v57  ;;  %v5222_v57 = vld [vmem:[%s8666_s1 + $0x260] sm:$0xff] }
 0x132   : > { %1736 = vmatprep.mubr.f32.mxu0 %v6605_v0 }
 0x133   : > { %5834 = vmatmul.mubr.msk.f32.gmra.mrb[34].mxu1 %vm339_vm3, %v6957_v60  ;;  %v5225_v60 = vld [vmem:[%s8666_s1 + $0x278] sm:$0xff] }
 0x134   : > { %5190 = vmatmul.mubr.msk.f32.gmra.mrb[26].mxu0 %vm339_vm3, %v7301_v38  ;;  %5836 = vmatprep.mubr.msk.f32.mxu1 %vm339_vm3, %v6971_v62  ;;  %v5261_v62 = vld [vmem:[%s8666_s1 + $0x280] sm:$0xff] }
 0x135   : > { %1742 = vmatprep.mubr.f32.mxu0 %v6605_v0 }
 0x137   : > { %5837 = vmatmul.mubr.msk.f32.gmra.mrb[36].mxu1 %vm339_vm3, %v6984_v3  ;;  %v7498_v3 = vpop.permute.xlu1 %3289 }
 0x138   : > { %5191 = vmatmul.mubr.msk.f32.gmra.mrb[28].mxu0 %vm339_vm3, %v7314_v21  ;;  %5839 = vmatprep.mubr.msk.f32.mxu1 %vm339_vm3, %v6997_v5  ;;  %v3295_v5 = vsel %vm3293_vm9, %v7498_v3, %v7500_v4 }
 0x139   : > { %1748 = vmatprep.mubr.f32.mxu0 %v6605_v0 }
 0x13b   : > { %5840 = vmatmul.mubr.msk.f32.gmra.mrb[38].mxu1 %vm339_vm3, %v7010_v7 }
 0x13c   : > { %5192 = vmatmul.mubr.msk.f32.gmra.mrb[30].mxu0 %vm339_vm3, %v7326_v39  ;;  %5842 = vmatprep.mubr.msk.f32.mxu1 %vm339_vm3, %v7021_v8  ;;  %v5263_v8 = vld [vmem:[%s8666_s1 + $0x290] sm:$0xff] }
 0x13d   : > { %2097 = vmatprep.mubr.f32.mxu0 %v6605_v0 }
 0x13f   : > { %5843 = vmatmul.mubr.msk.f32.gmra.mrb[40].mxu1 %vm339_vm3, %v7036_v9 }
 0x140   : > { %5228 = vmatmul.mubr.msk.f32.vlgmr.msra.gmra.mrb[0].mxu0 %vm339_vm3, %v7338_v41  ;;  %5845 = vmatprep.mubr.msk.f32.mxu1 %vm339_vm3, %v7049_v10 }
 0x141   : > { %5278 = vmatpush1.msk.msra.mxu0 %vm388_vm0, %v2416_v42  ;;  %2103 = vmatprep.mubr.f32.mxu0 %v6605_v0 }
 0x142   : > { %5328 = vmatprep.subr.msk.mxu0 %vm388_vm0, %v2856_v45 }
 0x143   : > { %5846 = vmatmul.mubr.msk.f32.gmra.mrb[42].mxu1 %vm339_vm3, %v7061_v11  ;;  %v5264_v11 = vld [vmem:[%s8666_s1 + $0x298] sm:$0xff] }
 0x144   : > { %5229 = vmatmul.mubr.msk.f32.gmra.mrb[2].mxu0 %vm339_vm3, %v5211_v46  ;;  %5848 = vmatprep.mubr.msk.f32.mxu1 %vm339_vm3, %v7073_v13 }
 0x145   : > { %2109 = vmatprep.mubr.f32.mxu0 %v6605_v0 }
 0x147   : > { %5849 = vmatmul.mubr.msk.f32.gmra.mrb[44].mxu1 %vm339_vm3, %v7085_v15 }
 0x148   : > { %5230 = vmatmul.mubr.msk.f32.gmra.mrb[4].mxu0 %vm339_vm3, %v5212_v47  ;;  %5851 = vmatprep.mubr.msk.f32.mxu1 %vm339_vm3, %v7095_v16  ;;  %v5265_v16 = vld [vmem:[%s8666_s1 + $0x2a0] sm:$0xff] }
 0x149   : > { %2115 = vmatprep.mubr.f32.mxu0 %v6605_v0 }
 0x14b   : > { %5852 = vmatmul.mubr.msk.f32.gmra.mrb[46].mxu1 %vm339_vm3, %v7106_v19 }
 0x14c   : > { %5231 = vmatmul.mubr.msk.f32.gmra.mrb[6].mxu0 %vm339_vm3, %v5213_v48  ;;  %5856 = vmatprep.mubr.msk.f32.mxu1 %vm339_vm3, %v7122_v25 }
 0x14d   : > { %2121 = vmatprep.mubr.f32.mxu0 %v6605_v0 }
 0x14f   : > { %5857 = vmatmul.mubr.msk.f32.vlgmr.msra.gmra.mrb[32].mxu1 %vm339_vm3, %v7149_v1 }
 0x150   : > { %5232 = vmatmul.mubr.msk.f32.gmra.mrb[8].mxu0 %vm339_vm3, %v5214_v50  ;;  %5881 = vmatpush3.msk.msra.mxu1 %vm388_vm0, %v6893_v49  ;;  %v5216_v49 = vld [vmem:[%s8666_s1 + $0x230] sm:$0xff] }
 0x151   : > { %5906 = vmatprep.subr.msk.mxu1 %vm388_vm0, %v7124_v2  ;;  %5859 = vmatprep.mubr.msk.f32.mxu1 %vm339_vm3, %v7165_v31 }
 0x152   : > { %2127 = vmatprep.mubr.f32.mxu0 %v6605_v0 }
 0x153   : > { %5860 = vmatmul.mubr.msk.f32.gmra.mrb[34].mxu1 %vm339_vm3, %v7178_v34 }
 0x154   : > { %5233 = vmatmul.mubr.msk.f32.gmra.mrb[10].mxu0 %vm339_vm3, %v5215_v51  ;;  %5862 = vmatprep.mubr.msk.f32.mxu1 %vm339_vm3, %v7189_v36  ;;  %v5272_v36 = vld [vmem:[%s8666_s1 + $0x2d8] sm:$0xff] }
 0x155   : > { %2133 = vmatprep.mubr.f32.mxu0 %v6605_v0 }
 0x157   : > { %5863 = vmatmul.mubr.msk.f32.gmra.mrb[36].mxu1 %vm339_vm3, %v7204_v14 }
 0x158   : > { %5234 = vmatmul.mubr.msk.f32.gmra.mrb[12].mxu0 %vm339_vm3, %v5216_v49  ;;  %5865 = vmatprep.mubr.msk.f32.mxu1 %vm339_vm3, %v7217_v18  ;;  %v5273_v18 = vld [vmem:[%s8666_s1 + $0x2e0] sm:$0xff] }
 0x159   : > { %2139 = vmatprep.mubr.f32.mxu0 %v6605_v0 }
 0x15b   : > { %5866 = vmatmul.mubr.msk.f32.gmra.mrb[38].mxu1 %vm339_vm3, %v7229_v20 }
 0x15c   : > { %5235 = vmatmul.mubr.msk.f32.gmra.mrb[14].mxu0 %vm339_vm3, %v5217_v52  ;;  %5868 = vmatprep.mubr.msk.f32.mxu1 %vm339_vm3, %v7241_v23  ;;  %v5274_v23 = vld [vmem:[%s8666_s1 + $0x2e8] sm:$0xff] }
 0x15d   : > { %2145 = vmatprep.mubr.f32.mxu0 %v6605_v0 }
 0x15f   : > { %5869 = vmatmul.mubr.msk.f32.gmra.mrb[40].mxu1 %vm339_vm3, %v7253_v27 }
 0x160   : > { %5236 = vmatmul.mubr.msk.f32.gmra.mrb[16].mxu0 %vm339_vm3, %v5218_v53  ;;  %5871 = vmatprep.mubr.msk.f32.mxu1 %vm339_vm3, %v7265_v33  ;;  %v5275_v33 = vld [vmem:[%s8666_s1 + $0x2f0] sm:$0xff] }
 0x161   : > { %2151 = vmatprep.mubr.f32.mxu0 %v6605_v0 }
 0x163   : > { %5872 = vmatmul.mubr.msk.f32.gmra.mrb[42].mxu1 %vm339_vm3, %v7275_v35 }
 0x164   : > { %5237 = vmatmul.mubr.msk.f32.gmra.mrb[18].mxu0 %vm339_vm3, %v5219_v54  ;;  %5874 = vmatprep.mubr.msk.f32.mxu1 %vm339_vm3, %v7286_v37  ;;  %v5276_v37 = vld [vmem:[%s8666_s1 + $0x2f8] sm:$0xff] }
 0x165   : > { %2157 = vmatprep.mubr.f32.mxu0 %v6605_v0 }
 0x167   : > { %5875 = vmatmul.mubr.msk.f32.gmra.mrb[44].mxu1 %vm339_vm3, %v7301_v38 }
 0x168   : > { %5238 = vmatmul.mubr.msk.f32.gmra.mrb[20].mxu0 %vm339_vm3, %v5220_v55  ;;  %5877 = vmatprep.mubr.msk.f32.mxu1 %vm339_vm3, %v7314_v21  ;;  %v5312_v21 = vld [vmem:[%s8666_s1 + $0x300] sm:$0xff] }
 0x169   : > { %2163 = vmatprep.mubr.f32.mxu0 %v6605_v0 }
 0x16b   : > { %5878 = vmatmul.mubr.msk.f32.gmra.mrb[46].mxu1 %vm339_vm3, %v7326_v39  ;;  %v3288_v39 = vpop.permute.xlu1 %3287 }
 0x16c   : > { %5239 = vmatmul.mubr.msk.f32.gmra.mrb[22].mxu0 %vm339_vm3, %v5221_v56  ;;  %5882 = vmatprep.mubr.msk.f32.mxu1 %vm339_vm3, %v7338_v41  ;;  %v5313_v41 = vld [vmem:[%s8666_s1 + $0x308] sm:$0xff] }
 0x16d   : > { %2169 = vmatprep.mubr.f32.mxu0 %v6605_v0 }
 0x16f   : > { %5883 = vmatmul.mubr.msk.f32.vlgmr.msra.gmra.mrb[32].mxu1 %vm339_vm3, %v5211_v46  ;;  %v7658_v45 = vpop.permute.xlu1 %3730  ;;  %v7665_v46 = vld [vmem:[%s8666_s1 + $0x318] sm:$0xff] }
 0x170   : > { %5240 = vmatmul.mubr.msk.f32.gmra.mrb[24].mxu0 %vm339_vm3, %v5222_v57  ;;  %5907 = vmatpush3.msk.msra.mxu1 %vm388_vm0, %v7124_v2  ;;  %v5267_v2 = vld [vmem:[%s8666_s1 + $0x2b0] sm:$0xff] }
 0x171   : > { %2175 = vmatprep.mubr.f32.mxu0 %v6605_v0  ;;  %5885 = vmatprep.mubr.msk.f32.mxu1 %vm339_vm3, %v5212_v47 }
 0x172   : > { %5932 = vmatprep.subr.msk.mxu1 %vm388_vm0, %v7344_v44  ;;  %v7517_v7 = vpop.f32.mrb[0].mxu1 }
 0x173   : > { %5886 = vmatmul.mubr.msk.f32.gmra.mrb[34].mxu1 %vm339_vm3, %v5213_v48  ;;  %v7523_v9 = vpop.f32.mrb[1].mxu1  ;;  %v7673_v48 = vld [vmem:[%s8666_s1 + $0x320] sm:$0xff] }
 0x174   : > { %5241 = vmatmul.mubr.msk.f32.gmra.mrb[26].mxu0 %vm339_vm3, %v5223_v58  ;;  %5888 = vmatprep.mubr.msk.f32.mxu1 %vm339_vm3, %v5214_v50 }
 0x175   : > { %2181 = vmatprep.mubr.f32.mxu0 %v6605_v0 }
 0x176   : > { %v7528_v10 = vpop.f32.mrb[2].mxu1 }
 0x177   : > { %5889 = vmatmul.mubr.msk.f32.gmra.mrb[36].mxu1 %vm339_vm3, %v5215_v51  ;;  %v7534_v13 = vpop.f32.mrb[3].mxu1  ;;  %v7689_v51 = vld [vmem:[%s8666_s1 + $0x328] sm:$0xff] }
 0x178   : > { %5242 = vmatmul.mubr.msk.f32.gmra.mrb[28].mxu0 %vm339_vm3, %v5224_v59  ;;  %5891 = vmatprep.mubr.msk.f32.mxu1 %vm339_vm3, %v5216_v49  ;;  %v7695_v49 = vld [vmem:[%s8666_s1 + $0x330] sm:$0xff] }
 0x179   : > { %2187 = vmatprep.mubr.f32.mxu0 %v6605_v0 }
 0x17a   : > { %v7539_v15 = vpop.f32.mrb[4].mxu1 }
 0x17b   : > { %5892 = vmatmul.mubr.msk.f32.gmra.mrb[38].mxu1 %vm339_vm3, %v5217_v52  ;;  %v7545_v17 = vpop.f32.mrb[5].mxu1  ;;  %v7705_v52 = vld [vmem:[%s8666_s1 + $0x338] sm:$0xff] }
 0x17c   : > { %5243 = vmatmul.mubr.msk.f32.gmra.mrb[30].mxu0 %vm339_vm3, %v5225_v60  ;;  %5894 = vmatprep.mubr.msk.f32.mxu1 %vm339_vm3, %v5218_v53  ;;  %v7711_v53 = vld [vmem:[%s8666_s1 + $0x340] sm:$0xff] }
 0x17d   : > { %2536 = vmatprep.mubr.f32.mxu0 %v6605_v0 }
 0x17e   : > { %v7551_v19 = vpop.f32.mrb[6].mxu1 }
 0x17f   : > { %5895 = vmatmul.mubr.msk.f32.gmra.mrb[40].mxu1 %vm339_vm3, %v5219_v54  ;;  %v7558_v24 = vpop.f32.mrb[7].mxu1  ;;  %v7721_v54 = vld [vmem:[%s8666_s1 + $0x348] sm:$0xff] }
 0x180   : > { %5279 = vmatmul.mubr.msk.f32.vlgmr.msra.gmra.mrb[0].mxu0 %vm339_vm3, %v5261_v62  ;;  %5897 = vmatprep.mubr.msk.f32.mxu1 %vm339_vm3, %v5220_v55  ;;  %v7727_v55 = vld [vmem:[%s8666_s1 + $0x350] sm:$0xff] }
 0x181   : > { %5329 = vmatpush1.msk.msra.mxu0 %vm388_vm0, %v2855_v63  ;;  %2542 = vmatprep.mubr.f32.mxu0 %v6605_v0  ;;  %v4145_v63 = vld [vmem:[%s8667_s2 + $0x10] sm:$0xff] }
 0x182   : > { %5379 = vmatprep.subr.msk.mxu0 %vm388_vm0, %v3295_v5  ;;  %v7565_v25 = vpop.f32.mrb[8].mxu1  ;;  %v7777_v5 = vld [vmem:[%s8666_s1 + $0x370] sm:$0xff] }
 0x183   : > { %5898 = vmatmul.mubr.msk.f32.gmra.mrb[42].mxu1 %vm339_vm3, %v5221_v56  ;;  %v7571_v26 = vpop.f32.mrb[9].mxu1  ;;  %v6615_v56 = vmov 0  }
 0x184   : > { %5280 = vmatmul.mubr.msk.f32.gmra.mrb[2].mxu0 %vm339_vm3, %v5262_v6  ;;  %5900 = vmatprep.mubr.msk.f32.mxu1 %vm339_vm3, %v5222_v57  ;;  %v4143_v57 = vld [vmem:[%s8667_s2] sm:$0xff] }
 0x185   : > { %2548 = vmatprep.mubr.f32.mxu0 %v6605_v0  ;;  %6594 = vset.pattern.permute.xlu1 %v6615_v56 }
 0x186   : > { %v7579_v29 = vpop.f32.mrb[10].mxu1  ;;  %4161 = vperm.xlu1 %6594, %v4143_v57   ;;  %6595 = vset.pattern.permute.xlu0 %v6615_v56 }
 0x187   : > { %5901 = vmatmul.mubr.msk.f32.gmra.mrb[44].mxu1 %vm339_vm3, %v5223_v58  ;;  %v7585_v1 = vpop.f32.mrb[11].mxu1  ;;  %v3294_v58 = vsel %vm3293_vm9, %v3288_v39, %v7498_v3  ;;  %v4144_v3 = vld [vmem:[%s8667_s2 + $0x8] sm:$0xff]  ;;  %v7871_v39 = vld [vmem:[%s8666_s1 + $0x3b0] sm:$0xff] }
 0x188   : > { %5281 = vmatmul.mubr.msk.f32.gmra.mrb[4].mxu0 %vm339_vm3, %v5263_v8  ;;  %5903 = vmatprep.mubr.msk.f32.mxu1 %vm339_vm3, %v5224_v59  ;;  %v7734_v59 = vpop.permute.xlu0 %3728 }
 0x189   : > { %2554 = vmatprep.mubr.f32.mxu0 %v6605_v0  ;;  %4166 = vperm.xlu0 %6595, %v4144_v3  }
 0x18a   : > { %v7593_v31 = vpop.f32.mrb[12].mxu1  ;;  %4171 = vperm.xlu1 %6594, %v4145_v63   ;;  %v7925_v63 = vld [vmem:[%s8666_s1 + $0x3d0] sm:$0xff] }
 0x18b   : > { %5904 = vmatmul.mubr.msk.f32.gmra.mrb[46].mxu1 %vm339_vm3, %v5225_v60  ;;  %v7599_v34 = vpop.f32.mrb[13].mxu1  ;;  %v3734_v60 = vsel %vm3732_vm10, %v7734_v59, %v7658_v45 }
 0x18c   : > { %5282 = vmatmul.mubr.msk.f32.gmra.mrb[6].mxu0 %vm339_vm3, %v5264_v11  ;;  %5908 = vmatprep.mubr.msk.f32.mxu1 %vm339_vm3, %v5261_v62  ;;  %v7754_v62 = vld [vmem:[%s8666_s1 + $0x360] sm:$0xff] }
 0x18d   : > { %2560 = vmatprep.mubr.f32.mxu0 %v6605_v0 }
 0x18e   : > { %v7607_v14 = vpop.f32.mrb[14].mxu1 }
 0x18f   : > { %5909 = vmatmul.mubr.msk.f32.vlgmr.msra.gmra.mrb[32].mxu1 %vm339_vm3, %v5262_v6  ;;  %v7613_v20 = vpop.f32.mrb[15].mxu1  ;;  %v4146_v6 = vld [vmem:[%s8667_s2 + $0x18] sm:$0xff] }
 0x190   : > { %5283 = vmatmul.mubr.msk.f32.gmra.mrb[8].mxu0 %vm339_vm3, %v5265_v16  ;;  %5933 = vmatpush3.msk.msra.mxu1 %vm388_vm0, %v7344_v44 }
 0x191   : > { %2566 = vmatprep.mubr.f32.mxu0 %v6605_v0  ;;  %5911 = vmatprep.mubr.msk.f32.mxu1 %vm339_vm3, %v5263_v8  ;;  %v7790_v8 = vld [vmem:[%s8666_s1 + $0x378] sm:$0xff] }
 0x192   : > { %5958 = vmatprep.subr.msk.mxu1 %vm388_vm0, %v7500_v4  ;;  %v7621_v27 = vpop.f32.mrb[16].mxu1  ;;  %4176 = vperm.xlu1 %6594, %v4146_v6  }
 0x193   : > { %5912 = vmatmul.mubr.msk.f32.gmra.mrb[34].mxu1 %vm339_vm3, %v5264_v11  ;;  %v7627_v35 = vpop.f32.mrb[17].mxu1  ;;  %v7796_v11 = vld [vmem:[%s8666_s1 + $0x380] sm:$0xff] }
 0x194   : > { %5284 = vmatmul.mubr.msk.f32.gmra.mrb[10].mxu0 %vm339_vm3, %v5266_v22  ;;  %5914 = vmatprep.mubr.msk.f32.mxu1 %vm339_vm3, %v5265_v16  ;;  %v4148_v16 = vld [vmem:[%s8667_s2 + $0x28] sm:$0xff] }
 0x195   : > { %2572 = vmatprep.mubr.f32.mxu0 %v6605_v0 }
 0x196   : > { %v7635_v38 = vpop.f32.mrb[18].mxu1  ;;  %4186 = vperm.xlu1 %6594, %v4148_v16   ;;  %v7943_v16 = vld [vmem:[%s8666_s1 + $0x3d8] sm:$0xff] }
 0x197   : > { %5915 = vmatmul.mubr.msk.f32.gmra.mrb[36].mxu1 %vm339_vm3, %v5266_v22  ;;  %v7641_v40 = vpop.f32.mrb[19].mxu1  ;;  %v7810_v22 = vld [vmem:[%s8666_s1 + $0x388] sm:$0xff] }
 0x198   : > { %5285 = vmatmul.mubr.msk.f32.gmra.mrb[12].mxu0 %vm339_vm3, %v5267_v2  ;;  %5917 = vmatprep.mubr.msk.f32.mxu1 %vm339_vm3, %v5267_v2  ;;  %v4147_v2 = vld [vmem:[%s8667_s2 + $0x20] sm:$0xff] }
 0x199   : > { %2578 = vmatprep.mubr.f32.mxu0 %v6605_v0  ;;  %4181 = vperm.xlu0 %6595, %v4147_v2   ;;  %v4157_v2 = vld [vmem:[%s8667_s2 + $0x70] sm:$0xff] }
 0x19a   : > { %v7649_v42 = vpop.f32.mrb[20].mxu1 }
 0x19b   : > { %5918 = vmatmul.mubr.msk.f32.gmra.mrb[38].mxu1 %vm339_vm3, %v5268_v28  ;;  %v7655_v44 = vpop.f32.mrb[21].mxu1 }
 0x19c   : > { %5286 = vmatmul.mubr.msk.f32.gmra.mrb[14].mxu0 %vm339_vm3, %v5268_v28  ;;  %5920 = vmatprep.mubr.msk.f32.mxu1 %vm339_vm3, %v5269_v30  ;;  %v7819_v28 = vld [vmem:[%s8666_s1 + $0x390] sm:$0xff] }
 0x19d   : > { %2584 = vmatprep.mubr.f32.mxu0 %v6605_v0 }
 0x19e   : > { %v7667_v47 = vpop.f32.mrb[22].mxu1 }
 0x19f   : > { %5921 = vmatmul.mubr.msk.f32.gmra.mrb[40].mxu1 %vm339_vm3, %v5270_v12  ;;  %v7677_v50 = vpop.f32.mrb[23].mxu1 }
 0x1a0   : > { %5287 = vmatmul.mubr.msk.f32.gmra.mrb[16].mxu0 %vm339_vm3, %v5269_v30  ;;  %5923 = vmatprep.mubr.msk.f32.mxu1 %vm339_vm3, %v5271_v32  ;;  %v4150_v30 = vld [vmem:[%s8667_s2 + $0x38] sm:$0xff] }
 0x1a1   : > { %2590 = vmatprep.mubr.f32.mxu0 %v6605_v0  ;;  %4196 = vperm.xlu1 %6594, %v4150_v30   ;;  %v7952_v30 = vld [vmem:[%s8666_s1 + $0x3e0] sm:$0xff] }
 0x1a3   : > { %5924 = vmatmul.mubr.msk.f32.gmra.mrb[42].mxu1 %vm339_vm3, %v5272_v36 }
 0x1a4   : > { %5288 = vmatmul.mubr.msk.f32.gmra.mrb[18].mxu0 %vm339_vm3, %v5270_v12  ;;  %5926 = vmatprep.mubr.msk.f32.mxu1 %vm339_vm3, %v5273_v18  ;;  %v7833_v12 = vld [vmem:[%s8666_s1 + $0x398] sm:$0xff] }
 0x1a5   : > { %2596 = vmatprep.mubr.f32.mxu0 %v6605_v0 }
 0x1a7   : > { %5927 = vmatmul.mubr.msk.f32.gmra.mrb[44].mxu1 %vm339_vm3, %v5274_v23 }
 0x1a8   : > { %5289 = vmatmul.mubr.msk.f32.gmra.mrb[20].mxu0 %vm339_vm3, %v5271_v32  ;;  %5929 = vmatprep.mubr.msk.f32.mxu1 %vm339_vm3, %v5275_v33  ;;  %v4149_v32 = vld [vmem:[%s8667_s2 + $0x30] sm:$0xff] }
 0x1a9   : > { %2602 = vmatprep.mubr.f32.mxu0 %v6605_v0  ;;  %4191 = vperm.xlu0 %6595, %v4149_v32   ;;  %v7969_v32 = vld [vmem:[%s8666_s1 + $0x3f0] sm:$0xff] }
 0x1ab   : > { %5930 = vmatmul.mubr.msk.f32.gmra.mrb[46].mxu1 %vm339_vm3, %v5276_v37 }
 0x1ac   : > { %5290 = vmatmul.mubr.msk.f32.gmra.mrb[22].mxu0 %vm339_vm3, %v5272_v36  ;;  %5934 = vmatprep.mubr.msk.f32.mxu1 %vm339_vm3, %v5312_v21  ;;  %v7842_v36 = vld [vmem:[%s8666_s1 + $0x3a0] sm:$0xff] }
 0x1ad   : > { %2608 = vmatprep.mubr.f32.mxu0 %v6605_v0 }
 0x1af   : > { %5935 = vmatmul.mubr.msk.f32.vlgmr.msra.gmra.mrb[32].mxu1 %vm339_vm3, %v5313_v41 }
 0x1b0   : > { %5291 = vmatmul.mubr.msk.f32.gmra.mrb[24].mxu0 %vm339_vm3, %v5273_v18  ;;  %5937 = vmatprep.mubr.msk.f32.mxu1 %vm339_vm3, %v5314_v43  ;;  %v4152_v18 = vld [vmem:[%s8667_s2 + $0x48] sm:$0xff] }
 0x1b1   : > { %2614 = vmatprep.mubr.f32.mxu0 %v6605_v0  ;;  %5959 = vmatpush3.msk.msra.mxu1 %vm388_vm0, %v7500_v4  ;;  %v7771_v4 = vld [vmem:[%s8666_s1 + $0x368] sm:$0xff] }
 0x1b2   : > { %5984 = vmatprep.subr.msk.mxu1 %vm388_vm0, %v7658_v45  ;;  %4206 = vperm.xlu1 %6594, %v4152_v18   ;;  %v7986_v18 = vld [vmem:[%s8666_s1 + $0x400] sm:$0xff] }
 0x1b3   : > { %5938 = vmatmul.mubr.msk.f32.gmra.mrb[34].mxu1 %vm339_vm3, %v7665_v46 }
 0x1b4   : > { %5292 = vmatmul.mubr.msk.f32.gmra.mrb[26].mxu0 %vm339_vm3, %v5274_v23  ;;  %5940 = vmatprep.mubr.msk.f32.mxu1 %vm339_vm3, %v7673_v48 }
 0x1b5   : > { %2620 = vmatprep.mubr.f32.mxu0 %v6605_v0 }
 0x1b7   : > { %5941 = vmatmul.mubr.msk.f32.gmra.mrb[36].mxu1 %vm339_vm3, %v7689_v51 }
 0x1b8   : > { %5293 = vmatmul.mubr.msk.f32.gmra.mrb[28].mxu0 %vm339_vm3, %v5275_v33  ;;  %5943 = vmatprep.mubr.msk.f32.mxu1 %vm339_vm3, %v7695_v49 }
 0x1b9   : > { %2626 = vmatprep.mubr.f32.mxu0 %v6605_v0 }
 0x1bb   : > { %5944 = vmatmul.mubr.msk.f32.gmra.mrb[38].mxu1 %vm339_vm3, %v7705_v52 }
 0x1bc   : > { %5294 = vmatmul.mubr.msk.f32.gmra.mrb[30].mxu0 %vm339_vm3, %v5276_v37  ;;  %5946 = vmatprep.mubr.msk.f32.mxu1 %vm339_vm3, %v7711_v53  ;;  %v7862_v37 = vld [vmem:[%s8666_s1 + $0x3a8] sm:$0xff] }
 0x1bd   : > { %2975 = vmatprep.mubr.f32.mxu0 %v6605_v0 }
 0x1bf   : > { %5947 = vmatmul.mubr.msk.f32.gmra.mrb[40].mxu1 %vm339_vm3, %v7721_v54 }
 0x1c0   : > { %5330 = vmatmul.mubr.msk.f32.vlgmr.msra.gmra.mrb[0].mxu0 %vm339_vm3, %v5312_v21  ;;  %5949 = vmatprep.mubr.msk.f32.mxu1 %vm339_vm3, %v7727_v55  ;;  %v4151_v21 = vld [vmem:[%s8667_s2 + $0x40] sm:$0xff] }
 0x1c1   : > { %5380 = vmatpush1.msk.msra.mxu0 %vm388_vm0, %v3294_v58  ;;  %2981 = vmatprep.mubr.f32.mxu0 %v6605_v0  ;;  %v7916_v58 = vld [vmem:[%s8666_s1 + $0x3c8] sm:$0xff] }
 0x1c2   : > { %5430 = vmatprep.subr.msk.mxu0 %vm388_vm0, %v3734_v60  ;;  %4201 = vperm.xlu0 %6595, %v4151_v21   ;;  %v4155_v60 = vld [vmem:[%s8667_s2 + $0x60] sm:$0xff]  ;;  %v8003_v21 = vld [vmem:[%s8666_s1 + $0x410] sm:$0xff] }
 0x1c3   : > { %5950 = vmatmul.mubr.msk.f32.gmra.mrb[42].mxu1 %vm339_vm3, %v7747_v61 }
 0x1c4   : > { %5331 = vmatmul.mubr.msk.f32.gmra.mrb[2].mxu0 %vm339_vm3, %v5313_v41  ;;  %5952 = vmatprep.mubr.msk.f32.mxu1 %vm339_vm3, %v7754_v62  ;;  %v4154_v41 = vld [vmem:[%s8667_s2 + $0x58] sm:$0xff] }
 0x1c5   : > { %2987 = vmatprep.mubr.f32.mxu0 %v6605_v0  ;;  %4216 = vperm.xlu1 %6594, %v4154_v41   ;;  %v8020_v41 = vld [vmem:[%s8666_s1 + $0x420] sm:$0xff] }
 0x1c7   : > { %5953 = vmatmul.mubr.msk.f32.gmra.mrb[44].mxu1 %vm339_vm3, %v7771_v4 }
 0x1c8   : > { %5332 = vmatmul.mubr.msk.f32.gmra.mrb[4].mxu0 %vm339_vm3, %v5314_v43  ;;  %5955 = vmatprep.mubr.msk.f32.mxu1 %vm339_vm3, %v7777_v5 }
 0x1c9   : > { %2993 = vmatprep.mubr.f32.mxu0 %v6605_v0 }
 0x1cb   : > { %5956 = vmatmul.mubr.msk.f32.gmra.mrb[46].mxu1 %vm339_vm3, %v7790_v8 }
 0x1cc   : > { %5333 = vmatmul.mubr.msk.f32.gmra.mrb[6].mxu0 %vm339_vm3, %v7665_v46  ;;  %5960 = vmatprep.mubr.msk.f32.mxu1 %vm339_vm3, %v7796_v11  ;;  %v7889_v46 = vld [vmem:[%s8666_s1 + $0x3b8] sm:$0xff] }
 0x1cd   : > { %2999 = vmatprep.mubr.f32.mxu0 %v6605_v0 }
 0x1cf   : > { %5961 = vmatmul.mubr.msk.f32.vlgmr.msra.gmra.mrb[32].mxu1 %vm339_vm3, %v7810_v22 }
 0x1d0   : > { %5334 = vmatmul.mubr.msk.f32.gmra.mrb[8].mxu0 %vm339_vm3, %v7673_v48  ;;  %5963 = vmatprep.mubr.msk.f32.mxu1 %vm339_vm3, %v7819_v28  ;;  %v4153_v48 = vld [vmem:[%s8667_s2 + $0x50] sm:$0xff] }
 0x1d1   : > { %3005 = vmatprep.mubr.f32.mxu0 %v6605_v0  ;;  %5985 = vmatpush3.msk.msra.mxu1 %vm388_vm0, %v7658_v45 }
 0x1d2   : > { %v7849_v23 = vpop.f32.mrb[24].mxu1  ;;  %4211 = vperm.xlu0 %6595, %v4153_v48   ;;  %v8037_v48 = vld [vmem:[%s8666_s1 + $0x430] sm:$0xff] }
 0x1d3   : > { %5964 = vmatmul.mubr.msk.f32.gmra.mrb[34].mxu1 %vm339_vm3, %v7833_v12  ;;  %v7853_v33 = vpop.f32.mrb[25].mxu1 }
 0x1d4   : > { %5335 = vmatmul.mubr.msk.f32.gmra.mrb[10].mxu0 %vm339_vm3, %v7689_v51  ;;  %5966 = vmatprep.mubr.msk.f32.mxu1 %vm339_vm3, %v7842_v36  ;;  %v7898_v51 = vld [vmem:[%s8666_s1 + $0x3c0] sm:$0xff] }
 0x1d5   : > { %3011 = vmatprep.mubr.f32.mxu0 %v6605_v0 }
 0x1d6   : > { %v7876_v43 = vpop.f32.mrb[26].mxu1  ;;  %4221 = vperm.xlu0 %6595, %v4155_v60   ;;  %v3727_v60 = vpop.permute.xlu0 %3726 }
 0x1d7   : > { %5967 = vmatmul.mubr.msk.f32.gmra.mrb[36].mxu1 %vm339_vm3, %v7862_v37  ;;  %v7880_v45 = vpop.f32.mrb[27].mxu1 }
 0x1d8   : > { %5336 = vmatmul.mubr.msk.f32.gmra.mrb[12].mxu0 %vm339_vm3, %v7695_v49  ;;  %5969 = vmatprep.mubr.msk.f32.mxu1 %vm339_vm3, %v7871_v39  ;;  %v4156_v49 = vld [vmem:[%s8667_s2 + $0x68] sm:$0xff] }
 0x1d9   : > { %3017 = vmatprep.mubr.f32.mxu0 %v6605_v0  ;;  %4226 = vperm.xlu1 %6594, %v4156_v49   ;;  %v8054_v49 = vld [vmem:[%s8666_s1 + $0x440] sm:$0xff] }
 0x1da   : > { %v7903_v56 = vpop.f32.mrb[28].mxu1  ;;  %4231 = vperm.xlu0 %6595, %v4157_v2   ;;  %v3733_v2 = vsel %vm3732_vm10, %v3727_v60, %v7734_v59  ;;  %v8091_v59 = vld [vmem:[%s8666_s1 + $0x460] sm:$0xff]  ;;  %v8108_v60 = vld [vmem:[%s8666_s1 + $0x470] sm:$0xff] }
 0x1db   : > { %5970 = vmatmul.mubr.msk.f32.gmra.mrb[38].mxu1 %vm339_vm3, %v7889_v46  ;;  %v7907_v57 = vpop.f32.mrb[29].mxu1 }
 0x1dc   : > { %5337 = vmatmul.mubr.msk.f32.gmra.mrb[14].mxu0 %vm339_vm3, %v7705_v52  ;;  %5972 = vmatprep.mubr.msk.f32.mxu1 %vm339_vm3, %v7898_v51  ;;  %v4158_v52 = vld [vmem:[%s8667_s2 + $0x78] sm:$0xff] }
 0x1dd   : > { %3023 = vmatprep.mubr.f32.mxu0 %v6605_v0  ;;  %4236 = vperm.xlu1 %6594, %v4158_v52   ;;  %v8071_v52 = vld [vmem:[%s8666_s1 + $0x450] sm:$0xff] }
 0x1de   : > { %v7930_v3 = vpop.f32.mrb[30].mxu1 }
 0x1df   : > { %5973 = vmatmul.mubr.msk.f32.gmra.mrb[40].mxu1 %vm339_vm3, %v7916_v58  ;;  %v7934_v6 = vpop.f32.mrb[31].mxu1 }
 0x1e0   : > { %5338 = vmatmul.mubr.msk.f32.gmra.mrb[16].mxu0 %vm339_vm3, %v7711_v53  ;;  %5975 = vmatprep.mubr.msk.f32.mxu1 %vm339_vm3, %v7925_v63  ;;  %v7963_v53 = vld [vmem:[%s8666_s1 + $0x3e8] sm:$0xff] }
 0x1e1   : > { %3029 = vmatprep.mubr.f32.mxu0 %v6605_v0 }
 0x1e3   : > { %5976 = vmatmul.mubr.msk.f32.gmra.mrb[42].mxu1 %vm339_vm3, %v7943_v16 }
 0x1e4   : > { %5339 = vmatmul.mubr.msk.f32.gmra.mrb[18].mxu0 %vm339_vm3, %v7721_v54  ;;  %5978 = vmatprep.mubr.msk.f32.mxu1 %vm339_vm3, %v7952_v30  ;;  %v7980_v54 = vld [vmem:[%s8666_s1 + $0x3f8] sm:$0xff] }
 0x1e5   : > { %3035 = vmatprep.mubr.f32.mxu0 %v6605_v0 }
 0x1e7   : > { %5979 = vmatmul.mubr.msk.f32.gmra.mrb[44].mxu1 %vm339_vm3, %v7963_v53 }
 0x1e8   : > { %5340 = vmatmul.mubr.msk.f32.gmra.mrb[20].mxu0 %vm339_vm3, %v7727_v55  ;;  %5981 = vmatprep.mubr.msk.f32.mxu1 %vm339_vm3, %v7969_v32  ;;  %v7997_v55 = vld [vmem:[%s8666_s1 + $0x408] sm:$0xff] }
 0x1e9   : > { %3041 = vmatprep.mubr.f32.mxu0 %v6605_v0 }
 0x1eb   : > { %5982 = vmatmul.mubr.msk.f32.gmra.mrb[46].mxu1 %vm339_vm3, %v7980_v54 }
 0x1ec   : > { %5341 = vmatmul.mubr.msk.f32.gmra.mrb[22].mxu0 %vm339_vm3, %v7747_v61  ;;  %5986 = vmatprep.mubr.msk.f32.mxu1 %vm339_vm3, %v7986_v18  ;;  %v8014_v61 = vld [vmem:[%s8666_s1 + $0x418] sm:$0xff] }
 0x1ed   : > { %3047 = vmatprep.mubr.f32.mxu0 %v6605_v0 }
 0x1ef   : > { %5987 = vmatmul.mubr.msk.f32.vlgmr.msra.gmra.mrb[32].mxu1 %vm339_vm3, %v7997_v55 }
 0x1f0   : > { %5342 = vmatmul.mubr.msk.f32.gmra.mrb[24].mxu0 %vm339_vm3, %v7754_v62  ;;  %5989 = vmatprep.mubr.msk.f32.mxu1 %vm339_vm3, %v8003_v21  ;;  %v8031_v62 = vld [vmem:[%s8666_s1 + $0x428] sm:$0xff] }
 0x1f1   : > { %3053 = vmatprep.mubr.f32.mxu0 %v6605_v0 }
 0x1f3   : > { %5990 = vmatmul.mubr.msk.f32.gmra.mrb[34].mxu1 %vm339_vm3, %v8014_v61 }
 0x1f4   : > { %5343 = vmatmul.mubr.msk.f32.gmra.mrb[26].mxu0 %vm339_vm3, %v7771_v4  ;;  %5992 = vmatprep.mubr.msk.f32.mxu1 %vm339_vm3, %v8020_v41  ;;  %v8048_v4 = vld [vmem:[%s8666_s1 + $0x438] sm:$0xff] }
 0x1f5   : > { %3059 = vmatprep.mubr.f32.mxu0 %v6605_v0 }
 0x1f7   : > { %5993 = vmatmul.mubr.msk.f32.gmra.mrb[36].mxu1 %vm339_vm3, %v8031_v62 }
 0x1f8   : > { %5344 = vmatmul.mubr.msk.f32.gmra.mrb[28].mxu0 %vm339_vm3, %v7777_v5  ;;  %5995 = vmatprep.mubr.msk.f32.mxu1 %vm339_vm3, %v8037_v48  ;;  %v8065_v5 = vld [vmem:[%s8666_s1 + $0x448] sm:$0xff] }
 0x1f9   : > { %3065 = vmatprep.mubr.f32.mxu0 %v6605_v0 }
 0x1fb   : > { %5996 = vmatmul.mubr.msk.f32.gmra.mrb[38].mxu1 %vm339_vm3, %v8048_v4 }
 0x1fc   : > { %5345 = vmatmul.mubr.msk.f32.gmra.mrb[30].mxu0 %vm339_vm3, %v7790_v8  ;;  %5998 = vmatprep.mubr.msk.f32.mxu1 %vm339_vm3, %v8054_v49  ;;  %v8084_v8 = vld [vmem:[%s8666_s1 + $0x458] sm:$0xff] }
 0x1fd   : > { %3414 = vmatprep.mubr.f32.mxu0 %v6605_v0 }
 0x1ff   : > { %5999 = vmatmul.mubr.msk.f32.gmra.mrb[40].mxu1 %vm339_vm3, %v8065_v5 }
 0x200   : > { %5381 = vmatmul.mubr.msk.f32.vlgmr.msra.gmra.mrb[0].mxu0 %vm339_vm3, %v7796_v11  ;;  %6001 = vmatprep.mubr.msk.f32.mxu1 %vm339_vm3, %v8071_v52  ;;  %v8102_v11 = vld [vmem:[%s8666_s1 + $0x468] sm:$0xff] }
 0x201   : > { %5431 = vmatpush1.msk.msra.mxu0 %vm388_vm0, %v3733_v2  ;;  %3420 = vmatprep.mubr.f32.mxu0 %v6605_v0 }
 0x203   : > { %6002 = vmatmul.mubr.msk.f32.gmra.mrb[42].mxu1 %vm339_vm3, %v8084_v8 }
 0x204   : > { %5382 = vmatmul.mubr.msk.f32.gmra.mrb[2].mxu0 %vm339_vm3, %v7810_v22  ;;  %6004 = vmatprep.mubr.msk.f32.mxu1 %vm339_vm3, %v8091_v59  ;;  %v8119_v22 = vld [vmem:[%s8666_s1 + $0x478] sm:$0xff] }
 0x205   : > { %3426 = vmatprep.mubr.f32.mxu0 %v6605_v0 }
 0x207   : > { %6005 = vmatmul.mubr.msk.f32.gmra.mrb[44].mxu1 %vm339_vm3, %v8102_v11 }
 0x208   : > { %5383 = vmatmul.mubr.msk.f32.gmra.mrb[4].mxu0 %vm339_vm3, %v7819_v28  ;;  %6007 = vmatprep.mubr.msk.f32.mxu1 %vm339_vm3, %v8108_v60  ;;  %v4364_v28 = vld [vmem:[%s8670_s5 + $0x80] sm:$0xff] }
 0x209   : > { %3432 = vmatprep.mubr.f32.mxu0 %v6605_v0 }
 0x20b   : > { %6008 = vmatmul.mubr.msk.f32.gmra.mrb[46].mxu1 %vm339_vm3, %v8119_v22 }
 0x20c   : > { %5384 = vmatmul.mubr.msk.f32.gmra.mrb[6].mxu0 %vm339_vm3, %v7833_v12  ;;  %v4365_v12 = vld [vmem:[%s8670_s5 + $0x88] sm:$0xff] }
 0x20d   : > { %3438 = vmatprep.mubr.f32.mxu0 %v6605_v0 }
 0x210   : > { %5385 = vmatmul.mubr.msk.f32.gmra.mrb[8].mxu0 %vm339_vm3, %v7842_v36  ;;  %v4348_v36 = vld [vmem:[%s8670_s5] sm:$0xff] }
 0x211   : > { %3444 = vmatprep.mubr.f32.mxu0 %v6605_v0 }
 0x214   : > { %5386 = vmatmul.mubr.msk.f32.gmra.mrb[10].mxu0 %vm339_vm3, %v7862_v37  ;;  %v6108_v37 = vpack.c.bf16 %v4365_v12, %v4364_v28  ;;  %v4356_v12 = vld [vmem:[%s8670_s5 + $0x40] sm:$0xff] }
 0x215   : > { %3450 = vmatprep.mubr.f32.mxu0 %v6605_v0 }
 0x216   : > { %6109 = vmatprep.subr.bf16.mxu1 %v6108_v37  ;;  %v4375_v37 = vld [vmem:[%s8670_s5 + $0xd8] sm:$0xff] }
 0x218   : > { %5387 = vmatmul.mubr.msk.f32.gmra.mrb[12].mxu0 %vm339_vm3, %v7871_v39  ;;  %v4349_v39 = vld [vmem:[%s8670_s5 + $0x8] sm:$0xff] }
 0x219   : > { %3456 = vmatprep.mubr.f32.mxu0 %v6605_v0 }
 0x21c   : > { %5388 = vmatmul.mubr.msk.f32.gmra.mrb[14].mxu0 %vm339_vm3, %v7889_v46  ;;  %v4366_v46 = vld [vmem:[%s8670_s5 + $0x90] sm:$0xff] }
 0x21d   : > { %3462 = vmatprep.mubr.f32.mxu0 %v6605_v0 }
 0x220   : > { %5389 = vmatmul.mubr.msk.f32.gmra.mrb[16].mxu0 %vm339_vm3, %v7898_v51  ;;  %v4367_v51 = vld [vmem:[%s8670_s5 + $0x98] sm:$0xff] }
 0x221   : > { %3468 = vmatprep.mubr.f32.mxu0 %v6605_v0 }
 0x224   : > { %5390 = vmatmul.mubr.msk.f32.gmra.mrb[18].mxu0 %vm339_vm3, %v7916_v58  ;;  %v6110_v58 = vpack.c.bf16 %v4349_v39, %v4348_v36  ;;  %v4374_v36 = vld [vmem:[%s8670_s5 + $0xd0] sm:$0xff] }
 0x225   : > { %3474 = vmatprep.mubr.f32.mxu0 %v6605_v0 }
 0x226   : > { %6111 = vmatpush3.bf16.msra.mxu1 %v6110_v58 }
 0x228   : > { %5391 = vmatmul.mubr.msk.f32.gmra.mrb[20].mxu0 %vm339_vm3, %v7925_v63  ;;  %v6112_v63 = vpack.c.bf16 %v4367_v51, %v4366_v46  ;;  %v6128_v46 = vpack.c.bf16 %v4375_v37, %v4374_v36  ;;  %v4358_v51 = vld [vmem:[%s8670_s5 + $0x50] sm:$0xff] }
 0x229   : > { %3480 = vmatprep.mubr.f32.mxu0 %v6605_v0 }
 0x22a   : > { %6113 = vmatprep.subr.bf16.mxu1 %v6112_v63  ;;  %v4376_v63 = vld [vmem:[%s8670_s5 + $0xe0] sm:$0xff] }
 0x22c   : > { %5392 = vmatmul.mubr.msk.f32.gmra.mrb[22].mxu0 %vm339_vm3, %v7943_v16  ;;  %v4350_v16 = vld [vmem:[%s8670_s5 + $0x10] sm:$0xff] }
 0x22d   : > { %3486 = vmatprep.mubr.f32.mxu0 %v6605_v0 }
 0x230   : > { %5393 = vmatmul.mubr.msk.f32.gmra.mrb[24].mxu0 %vm339_vm3, %v7952_v30  ;;  %v4351_v30 = vld [vmem:[%s8670_s5 + $0x18] sm:$0xff] }
 0x231   : > { %3492 = vmatprep.mubr.f32.mxu0 %v6605_v0 }
 0x234   : > { %5394 = vmatmul.mubr.msk.f32.gmra.mrb[26].mxu0 %vm339_vm3, %v7963_v53  ;;  %v4368_v53 = vld [vmem:[%s8670_s5 + $0xa0] sm:$0xff] }
 0x235   : > { %3498 = vmatprep.mubr.f32.mxu0 %v6605_v0 }
 0x238   : > { %5395 = vmatmul.mubr.msk.f32.gmra.mrb[28].mxu0 %vm339_vm3, %v7969_v32  ;;  %v4369_v32 = vld [vmem:[%s8670_s5 + $0xa8] sm:$0xff] }
 0x239   : > { %3504 = vmatprep.mubr.f32.mxu0 %v6605_v0 }
 0x23c   : > { %5396 = vmatmul.mubr.msk.f32.gmra.mrb[30].mxu0 %vm339_vm3, %v7980_v54  ;;  %v6114_v54 = vpack.c.bf16 %v4351_v30, %v4350_v16  ;;  %v4360_v30 = vld [vmem:[%s8670_s5 + $0x60] sm:$0xff] }
 0x23d   : > { %3853 = vmatprep.mubr.f32.mxu0 %v6605_v0 }
 0x23e   : > { %6115 = vmatpush3.bf16.msra.mxu1 %v6114_v54  ;;  %v4362_v54 = vld [vmem:[%s8670_s5 + $0x70] sm:$0xff] }
 0x240   : > { %5432 = vmatmul.mubr.msk.f32.vlgmr.msra.gmra.mrb[0].mxu0 %vm339_vm3, %v7986_v18  ;;  %v6116_v18 = vpack.c.bf16 %v4369_v32, %v4368_v53  ;;  %v4379_v53 = vld [vmem:[%s8670_s5 + $0xf8] sm:$0xff] }
 0x241   : > { %3859 = vmatprep.mubr.f32.mxu0 %v6605_v0 }
 0x242   : > { %6117 = vmatprep.subr.bf16.mxu1 %v6116_v18  ;;  %v4363_v18 = vld [vmem:[%s8670_s5 + $0x78] sm:$0xff] }
 0x244   : > { %5433 = vmatmul.mubr.msk.f32.gmra.mrb[2].mxu0 %vm339_vm3, %v7997_v55  ;;  %v4352_v55 = vld [vmem:[%s8670_s5 + $0x20] sm:$0xff] }
 0x245   : > { %3865 = vmatprep.mubr.f32.mxu0 %v6605_v0 }
 0x248   : > { %5434 = vmatmul.mubr.msk.f32.gmra.mrb[4].mxu0 %vm339_vm3, %v8003_v21  ;;  %v4353_v21 = vld [vmem:[%s8670_s5 + $0x28] sm:$0xff] }
 0x249   : > { %3871 = vmatprep.mubr.f32.mxu0 %v6605_v0 }
 0x24c   : > { %5435 = vmatmul.mubr.msk.f32.gmra.mrb[6].mxu0 %vm339_vm3, %v8014_v61  ;;  %v4370_v61 = vld [vmem:[%s8670_s5 + $0xb0] sm:$0xff] }
 0x24d   : > { %3877 = vmatprep.mubr.f32.mxu0 %v6605_v0 }
 0x250   : > { %5436 = vmatmul.mubr.msk.f32.gmra.mrb[8].mxu0 %vm339_vm3, %v8020_v41  ;;  %v4371_v41 = vld [vmem:[%s8670_s5 + $0xb8] sm:$0xff] }
 0x251   : > { %3883 = vmatprep.mubr.f32.mxu0 %v6605_v0 }
 0x254   : > { %5437 = vmatmul.mubr.msk.f32.gmra.mrb[10].mxu0 %vm339_vm3, %v8031_v62  ;;  %v6118_v62 = vpack.c.bf16 %v4353_v21, %v4352_v55  ;;  %v6138_v55 = vpack.c.bf16 %v4363_v18, %v4362_v54  ;;  %v4380_v21 = vld [vmem:[%s8670_s5 + $0x100] sm:$0xff] }
 0x255   : > { %3889 = vmatprep.mubr.f32.mxu0 %v6605_v0 }
 0x256   : > { %6119 = vmatpush3.bf16.msra.mxu1 %v6118_v62  ;;  %v4162_v62 = vpop.permute.xlu1 %4161 }
 0x258   : > { %5438 = vmatmul.mubr.msk.f32.gmra.mrb[12].mxu0 %vm339_vm3, %v8037_v48  ;;  %v6120_v48 = vpack.c.bf16 %v4371_v41, %v4370_v61  ;;  %v4381_v61 = vld [vmem:[%s8670_s5 + $0x108] sm:$0xff] }
 0x259   : > { %3895 = vmatprep.mubr.f32.mxu0 %v6605_v0  ;;  %v8312_v41 = vpack.c.bf16 %v4381_v61, %v4380_v21 }
 0x25a   : > { %6121 = vmatprep.subr.bf16.mxu1 %v6120_v48  ;;  %v8315_v48 = vpop.permute.xlu1 %4171 }
 0x25c   : > { %5439 = vmatmul.mubr.msk.f32.gmra.mrb[14].mxu0 %vm339_vm3, %v8048_v4  ;;  %v4354_v4 = vld [vmem:[%s8670_s5 + $0x30] sm:$0xff] }
 0x25d   : > { %3901 = vmatprep.mubr.f32.mxu0 %v6605_v0 }
 0x260   : > { %5440 = vmatmul.mubr.msk.f32.gmra.mrb[16].mxu0 %vm339_vm3, %v8054_v49  ;;  %v4355_v49 = vld [vmem:[%s8670_s5 + $0x38] sm:$0xff] }
 0x261   : > { %3907 = vmatprep.mubr.f32.mxu0 %v6605_v0  ;;  %v6122_v2 = vpack.c.bf16 %v4355_v49, %v4354_v4  ;;  %v4167_v4 = vpop.permute.xlu0 %4166 }
 0x263   : > { %6123 = vmatpush3.bf16.msra.mxu1 %v6122_v2 }
 0x264   : > { %5441 = vmatmul.mubr.msk.f32.gmra.mrb[18].mxu0 %vm339_vm3, %v8065_v5  ;;  %v4372_v5 = vld [vmem:[%s8670_s5 + $0xc0] sm:$0xff] }
 0x265   : > { %3913 = vmatprep.mubr.f32.mxu0 %v6605_v0 }
 0x268   : > { %5442 = vmatmul.mubr.msk.f32.gmra.mrb[20].mxu0 %vm339_vm3, %v8071_v52  ;;  %v4373_v52 = vld [vmem:[%s8670_s5 + $0xc8] sm:$0xff] }
 0x269   : > { %3919 = vmatprep.mubr.f32.mxu0 %v6605_v0  ;;  %v6124_v28 = vpack.c.bf16 %v4373_v52, %v4372_v5 }
 0x26b   : > { %6125 = vmatprep.subr.bf16.mxu1 %v6124_v28  ;;  %v8327_v28 = vpop.permute.xlu1 %4176 }
 0x26c   : > { %5443 = vmatmul.mubr.msk.f32.gmra.mrb[22].mxu0 %vm339_vm3, %v8084_v8  ;;  %v4357_v8 = vld [vmem:[%s8670_s5 + $0x48] sm:$0xff] }
 0x26d   : > { %3925 = vmatprep.mubr.f32.mxu0 %v6605_v0  ;;  %v6126_v39 = vpack.c.bf16 %v4357_v8, %v4356_v12 }
 0x26f   : > { %6127 = vmatpush3.bf16.msra.mxu1 %v6126_v39 }
 0x270   : > { %5444 = vmatmul.mubr.msk.f32.gmra.mrb[24].mxu0 %vm339_vm3, %v8091_v59  ;;  %v4359_v59 = vld [vmem:[%s8670_s5 + $0x58] sm:$0xff]  ;;  %6129 = vmatprep.subr.bf16.mxu1 %v6128_v46 }
 0x271   : > { %3931 = vmatprep.mubr.f32.mxu0 %v6605_v0  ;;  %v6130_v58 = vpack.c.bf16 %v4359_v59, %v4358_v51 }
 0x273   : > { %6131 = vmatpush3.bf16.msra.mxu1 %v6130_v58 }
 0x274   : > { %5445 = vmatmul.mubr.msk.f32.gmra.mrb[26].mxu0 %vm339_vm3, %v8102_v11  ;;  %v4377_v11 = vld [vmem:[%s8670_s5 + $0xe8] sm:$0xff] }
 0x275   : > { %3937 = vmatprep.mubr.f32.mxu0 %v6605_v0  ;;  %v6132_v16 = vpack.c.bf16 %v4377_v11, %v4376_v63 }
 0x277   : > { %6133 = vmatprep.subr.bf16.mxu1 %v6132_v16 }
 0x278   : > { %5446 = vmatmul.mubr.msk.f32.gmra.mrb[28].mxu0 %vm339_vm3, %v8108_v60 }
 0x279   : > { %3943 = vmatprep.mubr.f32.mxu0 %v6605_v0  ;;  %v4361_v0 = vld [vmem:[%s8670_s5 + $0x68] sm:$0xff] }
 0x27a   : > { %v6134_v60 = vpack.c.bf16 %v4361_v0, %v4360_v30 }
 0x27c   : > { %5447 = vmatmul.mubr.msk.f32.gmra.mrb[30].mxu0 %vm339_vm3, %v8119_v22  ;;  %6135 = vmatpush3.bf16.msra.mxu1 %v6134_v60  ;;  %v4378_v22 = vld [vmem:[%s8670_s5 + $0xf0] sm:$0xff] }
 0x27d   : > { %v6136_v32 = vpack.c.bf16 %v4379_v53, %v4378_v22 }
 0x27f   : > { %6137 = vmatprep.subr.bf16.mxu1 %v6136_v32 }
 0x280   : > { %6139 = vmatpush3.bf16.msra.mxu1 %v6138_v55 }
 0x281   : > { %6141 = vmatprep.subr.bf16.mxu1 %v8312_v41 }
 0x2c2   : > { %v5988_v49 = vpop.f32.mrb[32].mxu1 }
 0x2c3   : > { %v8318_v5 = vadd.f32 %v5988_v49, %v4167_v4  ;;  %v4016_v52 = vpop.f32.mrb[33].mxu1 }
 0x2c4   : > { %v8325_v2 = vadd.f32 %v4162_v62, %v4016_v52 }
 0x2c5   : > { %v8675_v12 = vmax.f32 %v8318_v5, 0.0 }
 0x2c6   : > { %v8676_v8 = vmax.f32 %v8325_v2, 0.0  ;;  %v5991_v36 = vpop.f32.mrb[34].mxu1 }
 0x2c7   : > { %4341 = vst.msk [vmem:[%s8323_s12 + $0x28] sm:$0xff] %vm4337_vm11, %v8675_v12  ;;  %v8336_v37 = vadd.f32 %v5991_v36, %v8327_v28  ;;  %v4026_v39 = vpop.f32.mrb[35].mxu1 }
 0x2c8   : > { %4338 = vst.msk [vmem:[%s8323_s12 + $0x10] sm:$0xff] %vm4337_vm11, %v8676_v8  ;;  %v8343_v46 = vadd.f32 %v8315_v48, %v4026_v39 }
 0x2c9   : > { %v8673_v51 = vmax.f32 %v8336_v37, 0.0 }
 0x2ca   : > { %v8674_v59 = vmax.f32 %v8343_v46, 0.0  ;;  %v8347_v58 = vpop.f32.mrb[36].mxu1 }
 0x2cb   : > { %4347 = vst.msk [vmem:[%s8323_s12 + $0x58] sm:$0xff] %vm4337_vm11, %v8673_v51  ;;  %v8353_v63 = vpop.f32.mrb[37].mxu1  ;;  %v4382_v51 = vld [vmem:[%s8670_s5 + $0x110] sm:$0xff] }
 0x2cc   : > { %4344 = vst.msk [vmem:[%s8323_s12 + $0x40] sm:$0xff] %vm4337_vm11, %v8674_v59  ;;  %v4383_v59 = vld [vmem:[%s8670_s5 + $0x118] sm:$0xff] }
 0x2ce   : > { %v8359_v11 = vpop.f32.mrb[38].mxu1 }
 0x2cf   : > { %v8361_v16 = vpop.f32.mrb[39].mxu1 }
 0x2d2   : > { %v8363_v30 = vpop.f32.mrb[40].mxu1 }
 0x2d3   : > { %v8365_v0 = vpop.f32.mrb[41].mxu1 }
 0x2d6   : > { %v8367_v60 = vpop.f32.mrb[42].mxu1 }
 0x2d7   : > { %v8369_v22 = vpop.f32.mrb[43].mxu1 }
 0x2da   : > { %v8371_v53 = vpop.f32.mrb[44].mxu1 }
 0x2db   : > { %v8373_v32 = vpop.f32.mrb[45].mxu1 }
 0x2de   : > { %v8375_v54 = vpop.f32.mrb[46].mxu1 }
 0x2df   : > { %8677 = vst [vmem:[#allocation2_spill] sm:$0xff] %v8375_v54  ;;  %v8377_v18 = vpop.f32.mrb[47].mxu1 }
 0x313   : > { %v3855_v55 = vpop.f32.mrb[0].mxu0 }
 0x314   : > { %v6190_v21 = vadd.f32 %v3855_v55, %v7517_v7  ;;  %v3857_v61 = vpop.f32.mrb[1].mxu0 }
 0x315   : > { %v6191_v49 = vadd.f32 %v3857_v61, %v7523_v9 }
 0x316   : > { %v4239_v52 = vadd.f32 %v6190_v21, %v4162_v62 }
 0x317   : > { %v4240_v36 = vadd.f32 %v6191_v49, %v4162_v62  ;;  %v3861_v39 = vpop.f32.mrb[2].mxu0  ;;  %v6144_v62 = vpack.c.bf16 %v4383_v59, %v4382_v51  ;;  %v4384_v49 = vld [vmem:[%s8670_s5 + $0x120] sm:$0xff] }
 0x318   : > { %v4287_v12 = vmax.f32 %v4239_v52, 0.0  ;;  %v6192_v8 = vadd.f32 %v3861_v39, %v7528_v10  ;;  %v3863_v54 = vpop.f32.mrb[3].mxu0  ;;  %v4385_v10 = vld [vmem:[%s8670_s5 + $0x128] sm:$0xff] }
 0x319   : > { %v4288_v7 = vmax.f32 %v4240_v36, 0.0  ;;  %v6193_v55 = vadd.f32 %v3863_v54, %v7534_v13  ;;  %v6148_v59 = vpack.c.bf16 %v4385_v10, %v4384_v49 }
 0x31a   : > { %4335 = vst [vmem:[%s8323_s12] sm:$0xff] %v4287_v12  ;;  %v4242_v9 = vadd.f32 %v6192_v8, %v4167_v4 }
 0x31b   : > { %4336 = vst [vmem:[%s8323_s12 + $0x8] sm:$0xff] %v4288_v7  ;;  %v4243_v21 = vadd.f32 %v6193_v55, %v4167_v4  ;;  %v3867_v61 = vpop.f32.mrb[4].mxu0  ;;  %4504 = vmatprep.mubr.f32.mxu1 %v4288_v7 }
 0x31c   : > { %v4290_v52 = vmax.f32 %v4242_v9, 0.0  ;;  %v6194_v13 = vadd.f32 %v3867_v61, %v7539_v15  ;;  %v3869_v54 = vpop.f32.mrb[5].mxu0  ;;  %4505 = vmatmul.mubr.f32.vlgmr.msra.gmra.mrb[48].mxu1 %v4287_v12  ;;  %v4386_v15 = vld [vmem:[%s8670_s5 + $0x130] sm:$0xff] }
 0x31d   : > { %v4291_v8 = vmax.f32 %v4243_v21, 0.0  ;;  %v6195_v51 = vadd.f32 %v3869_v54, %v7545_v17  ;;  %6143 = vmatpush3.bf16.msra.mxu1 %v8312_v41  ;;  %v4387_v17 = vld [vmem:[%s8670_s5 + $0x138] sm:$0xff] }
 0x31e   : > { %4339 = vst [vmem:[%s8323_s12 + $0x18] sm:$0xff] %v4290_v52  ;;  %v4245_v4 = vadd.f32 %v6194_v13, %v8315_v48  ;;  %6145 = vmatprep.subr.bf16.mxu1 %v6144_v62  ;;  %v6152_v21 = vpack.c.bf16 %v4387_v17, %v4386_v15  ;;  %v8417_v13 = vpop.permute.xlu0 %4181 }
 0x31f   : > { %4340 = vst [vmem:[%s8323_s12 + $0x20] sm:$0xff] %v4291_v8  ;;  %v4246_v36 = vadd.f32 %v6195_v51, %v8315_v48  ;;  %v3873_v39 = vpop.f32.mrb[6].mxu0  ;;  %4509 = vmatprep.mubr.f32.mxu1 %v4291_v8 }
 0x320   : > { %v4293_v41 = vmax.f32 %v4245_v4, 0.0  ;;  %v6196_v12 = vadd.f32 %v3873_v39, %v7551_v19  ;;  %v3875_v7 = vpop.f32.mrb[7].mxu0  ;;  %4510 = vmatmul.mubr.f32.gmra.mrb[50].mxu1 %v4290_v52 }
 0x321   : > { %v4294_v55 = vmax.f32 %v4246_v36, 0.0  ;;  %v6197_v9 = vadd.f32 %v3875_v7, %v7558_v24  ;;  %6147 = vmatpush3.bf16.msra.mxu1 %v6144_v62  ;;  %v8428_v36 = vpop.permute.xlu1 %4186 }
 0x322   : > { %4342 = vst [vmem:[%s8323_s12 + $0x30] sm:$0xff] %v4293_v41  ;;  %v4248_v48 = vadd.f32 %v6196_v12, %v8327_v28  ;;  %6149 = vmatprep.subr.bf16.mxu1 %v6148_v59  ;;  %v8435_v7 = vpop.permute.xlu0 %4191 }
 0x323   : > { %4343 = vst [vmem:[%s8323_s12 + $0x38] sm:$0xff] %v4294_v55  ;;  %v4249_v61 = vadd.f32 %v6197_v9, %v8327_v28  ;;  %v3879_v49 = vpop.f32.mrb[8].mxu0  ;;  %4514 = vmatprep.mubr.f32.mxu1 %v4294_v55 }
 0x324   : > { %v4296_v10 = vmax.f32 %v4248_v48, 0.0  ;;  %v6198_v19 = vadd.f32 %v3879_v49, %v7565_v25  ;;  %v3881_v52 = vpop.f32.mrb[9].mxu0  ;;  %4515 = vmatmul.mubr.f32.gmra.mrb[52].mxu1 %v4293_v41  ;;  %v4388_v25 = vld [vmem:[%s8670_s5 + $0x140] sm:$0xf] }
 0x325   : > { %v4297_v24 = vmax.f32 %v4249_v61, 0.0  ;;  %v6199_v62 = vadd.f32 %v3881_v52, %v7571_v26  ;;  %6151 = vmatpush3.bf16.msra.mxu1 %v6148_v59 }
 0x326   : > { %4345 = vst [vmem:[%s8323_s12 + $0x48] sm:$0xff] %v4296_v10  ;;  %v4251_v54 = vadd.f32 %v6198_v19, %v8417_v13  ;;  %6153 = vmatprep.subr.bf16.mxu1 %v6152_v21 }
 0x327   : > { %4346 = vst [vmem:[%s8323_s12 + $0x50] sm:$0xff] %v4297_v24  ;;  %v4252_v28 = vadd.f32 %v6199_v62, %v8417_v13  ;;  %v3885_v8 = vpop.f32.mrb[10].mxu0  ;;  %4519 = vmatprep.mubr.f32.mxu1 %v4297_v24 }
 0x328   : > { %v6200_v51 = vadd.f32 %v3885_v8, %v7579_v29  ;;  %v3887_v4 = vpop.f32.mrb[11].mxu0  ;;  %4520 = vmatmul.mubr.f32.gmra.mrb[54].mxu1 %v4296_v10  ;;  %v4299_v39 = vmax.f32 %v4251_v54, 0.0 }
 0x329   : > { %v4300_v26 = vmax.f32 %v4252_v28, 0.0  ;;  %v6201_v59 = vadd.f32 %v3887_v4, %v7585_v1  ;;  %6155 = vmatpush3.bf16.msra.mxu1 %v6152_v21 }
 0x32a   : > { %v4254_v15 = vadd.f32 %v6200_v51, %v8428_v36  ;;  %6026 = vmatprep.subr.msk.mxu1 %vm388_vm0, %v4388_v25 }
 0x32b   : > { %v4255_v17 = vadd.f32 %v6201_v59, %v8428_v36  ;;  %v3891_v41 = vpop.f32.mrb[12].mxu0  ;;  %4524 = vmatprep.mubr.f32.mxu1 %v4300_v26 }
 0x32c   : > { %v6202_v12 = vadd.f32 %v3891_v41, %v7593_v31  ;;  %v3893_v29 = vpop.f32.mrb[13].mxu0  ;;  %4525 = vmatmul.mubr.f32.gmra.mrb[56].mxu1 %v4299_v39  ;;  %v4302_v1 = vmax.f32 %v4254_v15, 0.0  ;;  %v8442_v31 = vpop.permute.xlu1 %4196 }
 0x32d   : > { %v4303_v55 = vmax.f32 %v4255_v17, 0.0  ;;  %v6203_v9 = vadd.f32 %v3893_v29, %v7599_v34  ;;  %6027 = vmatpush3.msk.msra.mxu1 %vm388_vm0, %v4388_v25  ;;  %v8448_v25 = vpop.permute.xlu0 %4201 }
 0x32e   : > { %v4257_v48 = vadd.f32 %v6202_v12, %v8435_v7 }
 0x32f   : > { %v4258_v21 = vadd.f32 %v6203_v9, %v8435_v7  ;;  %v3897_v61 = vpop.f32.mrb[14].mxu0  ;;  %4529 = vmatprep.mubr.f32.mxu1 %v4303_v55 }
 0x330   : > { %v6204_v49 = vadd.f32 %v3897_v61, %v7607_v14  ;;  %v3899_v10 = vpop.f32.mrb[15].mxu0  ;;  %4530 = vmatmul.mubr.f32.gmra.mrb[58].mxu1 %v4302_v1  ;;  %v4305_v24 = vmax.f32 %v4257_v48, 0.0  ;;  %v8454_v17 = vpop.permute.xlu1 %4206 }
 0x331   : > { %v4306_v19 = vmax.f32 %v4258_v21, 0.0  ;;  %v6205_v52 = vadd.f32 %v3899_v10, %v7613_v20  ;;  %v8460_v48 = vpop.permute.xlu0 %4211 }
 0x332   : > { %v4260_v34 = vadd.f32 %v6204_v49, %v8442_v31 }
 0x333   : > { %v4261_v62 = vadd.f32 %v6205_v52, %v8442_v31  ;;  %v3903_v54 = vpop.f32.mrb[16].mxu0  ;;  %4534 = vmatprep.mubr.f32.mxu1 %v4306_v19 }
 0x334   : > { %v6206_v28 = vadd.f32 %v3903_v54, %v7621_v27  ;;  %v3905_v8 = vpop.f32.mrb[17].mxu0  ;;  %4535 = vmatmul.mubr.f32.gmra.mrb[60].mxu1 %v4305_v24  ;;  %v4308_v4 = vmax.f32 %v4260_v34, 0.0  ;;  %v8466_v24 = vpop.permute.xlu1 %4216 }
 0x335   : > { %v4309_v14 = vmax.f32 %v4261_v62, 0.0  ;;  %v6207_v51 = vadd.f32 %v3905_v8, %v7627_v35 }
 0x336   : > { %v4263_v26 = vadd.f32 %v6206_v28, %v8448_v25 }
 0x337   : > { %v4264_v20 = vadd.f32 %v6207_v51, %v8448_v25  ;;  %v3909_v59 = vpop.f32.mrb[18].mxu0  ;;  %4539 = vmatprep.mubr.f32.mxu1 %v4309_v14  ;;  %v8472_v51 = vpop.permute.xlu0 %4221 }
 0x338   : > { %v6208_v39 = vadd.f32 %v3909_v59, %v7635_v38  ;;  %v3911_v15 = vpop.f32.mrb[19].mxu0  ;;  %4540 = vmatmul.mubr.f32.gmra.mrb[62].mxu1 %v4308_v4  ;;  %v4311_v12 = vmax.f32 %v4263_v26, 0.0 }
 0x339   : > { %v4312_v27 = vmax.f32 %v4264_v20, 0.0  ;;  %v6209_v41 = vadd.f32 %v3911_v15, %v7641_v40 }
 0x33a   : > { %v4266_v29 = vadd.f32 %v6208_v39, %v8454_v17 }
 0x33b   : > { %v4267_v35 = vadd.f32 %v6209_v41, %v8454_v17  ;;  %v3915_v55 = vpop.f32.mrb[20].mxu0  ;;  %4544 = vmatprep.mubr.f32.mxu1 %v4312_v27  ;;  %v4227_v27 = vpop.permute.xlu1 %4226 }
 0x33c   : > { %v6210_v9 = vadd.f32 %v3915_v55, %v7649_v42  ;;  %v3917_v1 = vpop.f32.mrb[21].mxu0  ;;  %4545 = vmatmul.mubr.f32.gmra.mrb[64].mxu1 %v4311_v12  ;;  %v4314_v61 = vmax.f32 %v4266_v29, 0.0 }
 0x33d   : > { %v4315_v38 = vmax.f32 %v4267_v35, 0.0  ;;  %v6211_v21 = vadd.f32 %v3917_v1, %v7655_v44  ;;  %v4232_v1 = vpop.permute.xlu0 %4231 }
 0x33e   : > { %v4269_v49 = vadd.f32 %v6210_v9, %v8460_v48 }
 0x33f   : > { %v4270_v40 = vadd.f32 %v6211_v21, %v8460_v48  ;;  %v3921_v10 = vpop.f32.mrb[22].mxu0  ;;  %4549 = vmatprep.mubr.f32.mxu1 %v4315_v38 }
 0x340   : > { %v6212_v19 = vadd.f32 %v3921_v10, %v7667_v47  ;;  %v3923_v52 = vpop.f32.mrb[23].mxu0  ;;  %4550 = vmatmul.mubr.f32.gmra.mrb[66].mxu1 %v4314_v61  ;;  %v4317_v62 = vmax.f32 %v4269_v49, 0.0 }
 0x341   : > { %v4318_v42 = vmax.f32 %v4270_v40, 0.0  ;;  %v6213_v34 = vadd.f32 %v3923_v52, %v7677_v50 }
 0x342   : > { %v4272_v54 = vadd.f32 %v6212_v19, %v8466_v24  ;;  %v4237_v19 = vpop.permute.xlu1 %4236 }
 0x343   : > { %v4273_v44 = vadd.f32 %v6213_v34, %v8466_v24  ;;  %v3927_v28 = vpop.f32.mrb[24].mxu0  ;;  %4554 = vmatprep.mubr.f32.mxu1 %v4318_v42 }
 0x344   : > { %v6214_v8 = vadd.f32 %v3927_v28, %v7849_v23  ;;  %v3929_v14 = vpop.f32.mrb[25].mxu0  ;;  %4555 = vmatmul.mubr.f32.gmra.mrb[68].mxu1 %v4317_v62  ;;  %v4320_v26 = vmax.f32 %v4272_v54, 0.0  ;;  %v8679_v28 = vmax.f32 %v8318_v5, 0.0 }
 0x345   : > { %v4321_v47 = vmax.f32 %v4273_v44, 0.0  ;;  %v6215_v4 = vadd.f32 %v3929_v14, %v7853_v33  ;;  %v8678_v44 = vmax.f32 %v8325_v2, 0.0  ;;  %v4259_v2 = vadd.f32 %v8435_v7, %v8361_v16 }
 0x346   : > { %v4275_v20 = vadd.f32 %v6214_v8, %v8472_v51  ;;  %v4256_v8 = vadd.f32 %v8347_v58, %v8428_v36  ;;  %v4271_v36 = vadd.f32 %v8460_v48, %v8369_v22 }
 0x347   : > { %v4276_v50 = vadd.f32 %v6215_v4, %v8472_v51  ;;  %v3933_v59 = vpop.f32.mrb[26].mxu0  ;;  %4559 = vmatprep.mubr.f32.mxu1 %v4321_v47  ;;  %v8681_v47 = vmax.f32 %v8336_v37, 0.0  ;;  %v4268_v37 = vadd.f32 %v8363_v30, %v8454_v17  ;;  %v4283_v17 = vadd.f32 %v4232_v1, %v8377_v18 }
 0x348   : > { %v6216_v39 = vadd.f32 %v3933_v59, %v7876_v43  ;;  %v3935_v15 = vpop.f32.mrb[27].mxu0  ;;  %4560 = vmatmul.mubr.f32.gmra.mrb[70].mxu1 %v4320_v26  ;;  %v4323_v12 = vmax.f32 %v4275_v20, 0.0  ;;  %v4304_v5 = vmax.f32 %v4256_v8, 0.0  ;;  %v4319_v7 = vmax.f32 %v4271_v36, 0.0 }
 0x349   : > { %v4324_v23 = vmax.f32 %v4276_v50, 0.0  ;;  %v6217_v41 = vadd.f32 %v3935_v15, %v7880_v45  ;;  %v4331_v4 = vmax.f32 %v4283_v17, 0.0 }
 0x34a   : > { %v4278_v29 = vadd.f32 %v6216_v39, %v4227_v27 }
 0x34b   : > { %v4279_v35 = vadd.f32 %v6217_v41, %v4227_v27  ;;  %v3939_v55 = vpop.f32.mrb[28].mxu0  ;;  %4564 = vmatprep.mubr.f32.mxu1 %v4324_v23 }
 0x34c   : > { %v6218_v33 = vadd.f32 %v3939_v55, %v7903_v56  ;;  %v3941_v9 = vpop.f32.mrb[29].mxu0  ;;  %4565 = vmatmul.mubr.f32.gmra.mrb[72].mxu1 %v4323_v12  ;;  %v4326_v43 = vmax.f32 %v4278_v29, 0.0 }
 0x34d   : > { %v4327_v38 = vmax.f32 %v4279_v35, 0.0  ;;  %v6219_v21 = vadd.f32 %v3941_v9, %v7907_v57 }
 0x34e   : > { %v4281_v61 = vadd.f32 %v6218_v33, %v4232_v1 }
 0x34f   : > { %v4282_v49 = vadd.f32 %v6219_v21, %v4232_v1  ;;  %v3945_v40 = vpop.f32.mrb[30].mxu0  ;;  %4569 = vmatprep.mubr.f32.mxu1 %v4327_v38 }
 0x350   : > { %v6220_v45 = vadd.f32 %v3945_v40, %v7930_v3  ;;  %v3947_v10 = vpop.f32.mrb[31].mxu0  ;;  %4570 = vmatmul.mubr.f32.gmra.mrb[74].mxu1 %v4326_v43  ;;  %v4329_v56 = vmax.f32 %v4281_v61, 0.0  ;;  %v4253_v3 = vadd.f32 %v8417_v13, %v8353_v63  ;;  %v4262_v63 = vadd.f32 %v8359_v11, %v8442_v31 }
 0x351   : > { %v4330_v52 = vmax.f32 %v4282_v49, 0.0  ;;  %v6221_v42 = vadd.f32 %v3947_v10, %v7934_v6  ;;  %v8680_v6 = vmax.f32 %v8343_v46, 0.0  ;;  %v4307_v46 = vmax.f32 %v4259_v2, 0.0 }
 0x352   : > { %v4284_v34 = vadd.f32 %v6220_v45, %v4237_v19  ;;  %v4301_v14 = vmax.f32 %v4253_v3, 0.0  ;;  %v4265_v13 = vadd.f32 %v8448_v25, %v8365_v0  ;;  %v4310_v58 = vmax.f32 %v4262_v63, 0.0 }
 0x353   : > { %v4285_v62 = vadd.f32 %v6221_v42, %v4237_v19  ;;  %4574 = vmatprep.mubr.f32.mxu1 %v4330_v52  ;;  %v4316_v11 = vmax.f32 %v4268_v37, 0.0  ;;  %v4274_v0 = vadd.f32 %v8367_v60, %v8466_v24  ;;  %v4277_v31 = vadd.f32 %v8472_v51, %v8373_v32  ;;  %v8682_v60 = vld [vmem:[#allocation2_spill] sm:$0xff] }
 0x354   : > { %4575 = vmatmul.mubr.f32.gmra.mrb[76].mxu1 %v4329_v56  ;;  %v4332_v57 = vmax.f32 %v4284_v34, 0.0  ;;  %v4313_v16 = vmax.f32 %v4265_v13, 0.0  ;;  %v4280_v25 = vadd.f32 %v8371_v53, %v4227_v27  ;;  %v4286_v24 = vadd.f32 %v8682_v60, %v4237_v19  ;;  %v4730_v53 = vld [vmem:[%s8668_s3] sm:$0xff] }
 0x355   : > { %v4333_v54 = vmax.f32 %v4285_v62, 0.0  ;;  %v4322_v30 = vmax.f32 %v4274_v0, 0.0  ;;  %v4325_v22 = vmax.f32 %v4277_v31, 0.0 }
 0x356   : > { %v4328_v48 = vmax.f32 %v4280_v25, 0.0  ;;  %v4334_v32 = vmax.f32 %v4286_v24, 0.0 }
 0x357   : > { %4579 = vmatprep.mubr.f32.mxu1 %v4333_v54 }
 0x358   : > { %4580 = vmatmul.mubr.f32.gmra.mrb[78].mxu1 %v4332_v57 }
 0x359   : > { %6028 = vmatprep.mubr.msk.f32.mxu1 %vm4337_vm11, %v8678_v44 }
 0x35c   : > { %6029 = vmatmul.mubr.msk.f32.vlgmr.msra.gmra.mrb[80].mxu1 %vm4337_vm11, %v8679_v28 }
 0x35d   : > { %6031 = vmatprep.mubr.msk.f32.mxu1 %vm4337_vm11, %v8680_v6 }
 0x360   : > { %6032 = vmatmul.mubr.msk.f32.gmra.mrb[82].mxu1 %vm4337_vm11, %v8681_v47 }
 0x361   : > { %6034 = vmatprep.mubr.msk.f32.mxu1 %vm4337_vm11, %v4301_v14 }
 0x364   : > { %6035 = vmatmul.mubr.msk.f32.gmra.mrb[84].mxu1 %vm4337_vm11, %v4304_v5 }
 0x365   : > { %6037 = vmatprep.mubr.msk.f32.mxu1 %vm4337_vm11, %v4307_v46 }
 0x368   : > { %6038 = vmatmul.mubr.msk.f32.gmra.mrb[86].mxu1 %vm4337_vm11, %v4310_v58 }
 0x369   : > { %6040 = vmatprep.mubr.msk.f32.mxu1 %vm4337_vm11, %v4313_v16 }
 0x36c   : > { %6041 = vmatmul.mubr.msk.f32.gmra.mrb[88].mxu1 %vm4337_vm11, %v4316_v11 }
 0x36d   : > { %6043 = vmatprep.mubr.msk.f32.mxu1 %vm4337_vm11, %v4319_v7 }
 0x370   : > { %6044 = vmatmul.mubr.msk.f32.gmra.mrb[90].mxu1 %vm4337_vm11, %v4322_v30 }
 0x371   : > { %6046 = vmatprep.mubr.msk.f32.mxu1 %vm4337_vm11, %v4325_v22 }
 0x374   : > { %6047 = vmatmul.mubr.msk.f32.gmra.mrb[92].mxu1 %vm4337_vm11, %v4328_v48 }
 0x375   : > { %6049 = vmatprep.mubr.msk.f32.mxu1 %vm4337_vm11, %v4331_v4 }
 0x378   : > { %6050 = vmatmul.mubr.msk.f32.gmra.mrb[94].mxu1 %vm4337_vm11, %v4334_v32 }
 0x379   : > { %6084 = vmatprep.mubr.f32.mxu1 %v4730_v53 }
 0x3ef   : > { %v5671_v18 = vpop.f32.mrb[48].mxu1 }
 0x3f0   : > { %v5672_v51 = vpop.f32.mrb[49].mxu1 }
 0x3f1   : > { %v5673_v26 = vadd.f32 %v5672_v51, %v5671_v18 }
 0x3f3   : > { %v5674_v20 = vpop.f32.mrb[50].mxu1 }
 0x3f4   : > { %v5675_v50 = vpop.f32.mrb[51].mxu1 }
 0x3f5   : > { %v5676_v59 = vadd.f32 %v5675_v50, %v5674_v20 }
 0x3f7   : > { %v5677_v39 = vpop.f32.mrb[52].mxu1 }
 0x3f8   : > { %v5678_v15 = vpop.f32.mrb[53].mxu1 }
 0x3f9   : > { %v5679_v27 = vadd.f32 %v5678_v15, %v5677_v39 }
 0x3fb   : > { %v5680_v23 = vpop.f32.mrb[54].mxu1 }
 0x3fc   : > { %v5681_v41 = vpop.f32.mrb[55].mxu1 }
 0x3fd   : > { %v5682_v12 = vadd.f32 %v5681_v41, %v5680_v23 }
 0x3ff   : > { %v5683_v29 = vpop.f32.mrb[56].mxu1 }
 0x400   : > { %v5684_v35 = vpop.f32.mrb[57].mxu1 }
 0x401   : > { %v5685_v55 = vadd.f32 %v5684_v35, %v5683_v29 }
 0x403   : > { %v5686_v33 = vpop.f32.mrb[58].mxu1 }
 0x404   : > { %v5687_v9 = vpop.f32.mrb[59].mxu1 }
 0x405   : > { %v5688_v1 = vadd.f32 %v5687_v9, %v5686_v33 }
 0x407   : > { %v5689_v38 = vpop.f32.mrb[60].mxu1 }
 0x408   : > { %v5690_v21 = vpop.f32.mrb[61].mxu1 }
 0x409   : > { %v5691_v43 = vadd.f32 %v5690_v21, %v5689_v38 }
 0x40b   : > { %v5692_v61 = vpop.f32.mrb[62].mxu1 }
 0x40c   : > { %v5693_v49 = vpop.f32.mrb[63].mxu1 }
 0x40d   : > { %v5694_v40 = vadd.f32 %v5693_v49, %v5692_v61 }
 0x40f   : > { %v5695_v45 = vpop.f32.mrb[64].mxu1 }
 0x410   : > { %v5696_v10 = vpop.f32.mrb[65].mxu1 }
 0x411   : > { %v5697_v19 = vadd.f32 %v5696_v10, %v5695_v45  ;;  %v4731_v45 = vld [vmem:[%s8668_s3 + $0x8] sm:$0xff]  ;;  %v4732_v10 = vld [vmem:[%s8668_s3 + $0x10] sm:$0xff] }
 0x413   : > { %v5698_v52 = vpop.f32.mrb[66].mxu1 }
 0x414   : > { %v5699_v42 = vpop.f32.mrb[67].mxu1 }
 0x415   : > { %v5700_v56 = vadd.f32 %v5699_v42, %v5698_v52  ;;  %v4734_v52 = vld [vmem:[%s8668_s3 + $0x20] sm:$0xff]  ;;  %v4735_v42 = vld [vmem:[%s8668_s3 + $0x28] sm:$0xff] }
 0x417   : > { %v5701_v34 = vpop.f32.mrb[68].mxu1 }
 0x418   : > { %v5702_v62 = vpop.f32.mrb[69].mxu1 }
 0x419   : > { %v5703_v54 = vadd.f32 %v5702_v62, %v5701_v34  ;;  %v4737_v34 = vld [vmem:[%s8668_s3 + $0x38] sm:$0xff]  ;;  %v4738_v62 = vld [vmem:[%s8668_s3 + $0x40] sm:$0xff] }
 0x41b   : > { %v5704_v57 = vpop.f32.mrb[70].mxu1 }
 0x41c   : > { %v5705_v44 = vpop.f32.mrb[71].mxu1 }
 0x41d   : > { %v5706_v3 = vadd.f32 %v5705_v44, %v5704_v57  ;;  %v4740_v57 = vld [vmem:[%s8668_s3 + $0x50] sm:$0xff]  ;;  %v4741_v44 = vld [vmem:[%s8668_s3 + $0x58] sm:$0xff] }
 0x41f   : > { %v5707_v28 = vpop.f32.mrb[72].mxu1 }
 0x420   : > { %v5708_v6 = vpop.f32.mrb[73].mxu1 }
 0x421   : > { %v5709_v8 = vadd.f32 %v5708_v6, %v5707_v28  ;;  %v4743_v28 = vld [vmem:[%s8668_s3 + $0x68] sm:$0xff]  ;;  %v4744_v6 = vld [vmem:[%s8668_s3 + $0x70] sm:$0xff] }
 0x423   : > { %v5710_v14 = vpop.f32.mrb[74].mxu1 }
 0x424   : > { %v5711_v2 = vpop.f32.mrb[75].mxu1 }
 0x425   : > { %v5712_v47 = vadd.f32 %v5711_v2, %v5710_v14  ;;  %v4747_v14 = vld [vmem:[%s8669_s4 + $0x8] sm:$0xff]  ;;  %v4746_v2 = vld [vmem:[%s8669_s4] sm:$0xff] }
 0x427   : > { %v5713_v5 = vpop.f32.mrb[76].mxu1 }
 0x428   : > { %v5714_v63 = vpop.f32.mrb[77].mxu1 }
 0x429   : > { %v5715_v46 = vadd.f32 %v5714_v63, %v5713_v5 }
 0x42b   : > { %v5716_v13 = vpop.f32.mrb[78].mxu1 }
 0x42c   : > { %v5717_v58 = vpop.f32.mrb[79].mxu1 }
 0x42d   : > { %v5718_v37 = vadd.f32 %v5717_v58, %v5716_v13  ;;  %v4749_v13 = vld [vmem:[%s8669_s4 + $0x18] sm:$0xff]  ;;  %v4748_v58 = vld [vmem:[%s8669_s4 + $0x10] sm:$0xff] }
 0x42f   : > { %v6030_v16 = vpop.f32.mrb[80].mxu1 }
 0x430   : > { %v4657_v36 = vadd.f32 %v6030_v16, %v5676_v59  ;;  %v4651_v11 = vpop.f32.mrb[81].mxu1 }
 0x431   : > { %v4652_v0 = vadd.f32 %v5673_v26, %v4651_v11 }
 0x433   : > { %v6156_v7 = vpack.c.bf16 %v4657_v36, %v4652_v0  ;;  %v6033_v31 = vpop.f32.mrb[82].mxu1  ;;  %v4751_v0 = vld [vmem:[%s8669_s4 + $0x28] sm:$0xff] }
 0x434   : > { %v4667_v30 = vadd.f32 %v6033_v31, %v5682_v12  ;;  %v4661_v25 = vpop.f32.mrb[83].mxu1 }
 0x435   : > { %v4662_v22 = vadd.f32 %v5679_v27, %v4661_v25  ;;  %6157 = vmatprep.subr.bf16.mxu1 %v6156_v7 }
 0x436   : > { %6159 = vmatpush3.bf16.msra.mxu1 %v6156_v7  ;;  %v4750_v7 = vld [vmem:[%s8669_s4 + $0x20] sm:$0xff] }
 0x437   : > { %v6160_v17 = vpack.c.bf16 %v4667_v30, %v4662_v22  ;;  %v6036_v48 = vpop.f32.mrb[84].mxu1 }
 0x438   : > { %v4677_v60 = vadd.f32 %v6036_v48, %v5688_v1  ;;  %v4671_v24 = vpop.f32.mrb[85].mxu1  ;;  %v4752_v48 = vld [vmem:[%s8669_s4 + $0x30] sm:$0xff] }
 0x439   : > { %v4672_v4 = vadd.f32 %v5685_v55, %v4671_v24  ;;  %6161 = vmatprep.subr.bf16.mxu1 %v6160_v17 }
 0x43a   : > { %6163 = vmatpush3.bf16.msra.mxu1 %v6160_v17  ;;  %v4753_v17 = vld [vmem:[%s8669_s4 + $0x38] sm:$0xff] }
 0x43b   : > { %v6164_v32 = vpack.c.bf16 %v4677_v60, %v4672_v4  ;;  %v6039_v53 = vpop.f32.mrb[86].mxu1 }
 0x43c   : > { %v4687_v18 = vadd.f32 %v6039_v53, %v5694_v40  ;;  %v4681_v51 = vpop.f32.mrb[87].mxu1  ;;  %v4755_v53 = vld [vmem:[%s8669_s4 + $0x48] sm:$0xff] }
 0x43d   : > { %v4682_v20 = vadd.f32 %v5691_v43, %v4681_v51  ;;  %6165 = vmatprep.subr.bf16.mxu1 %v6164_v32 }
 0x43e   : > { %6167 = vmatpush3.bf16.msra.mxu1 %v6164_v32 }
 0x43f   : > { %v6168_v26 = vpack.c.bf16 %v4687_v18, %v4682_v20  ;;  %v6042_v50 = vpop.f32.mrb[88].mxu1  ;;  %v4754_v18 = vld [vmem:[%s8669_s4 + $0x40] sm:$0xff] }
 0x440   : > { %v4697_v59 = vadd.f32 %v6042_v50, %v5700_v56  ;;  %v4691_v39 = vpop.f32.mrb[89].mxu1  ;;  %v4736_v56 = vld [vmem:[%s8668_s3 + $0x30] sm:$0xff] }
 0x441   : > { %v4692_v15 = vadd.f32 %v5697_v19, %v4691_v39  ;;  %6169 = vmatprep.subr.bf16.mxu1 %v6168_v26  ;;  %v4733_v19 = vld [vmem:[%s8668_s3 + $0x18] sm:$0xff]  ;;  %v4756_v39 = vld [vmem:[%s8669_s4 + $0x50] sm:$0xff] }
 0x442   : > { %6171 = vmatpush3.bf16.msra.mxu1 %v6168_v26 }
 0x443   : > { %v6172_v27 = vpack.c.bf16 %v4697_v59, %v4692_v15  ;;  %v6045_v23 = vpop.f32.mrb[90].mxu1  ;;  %v4757_v59 = vld [vmem:[%s8669_s4 + $0x58] sm:$0xff] }
 0x444   : > { %v4707_v41 = vadd.f32 %v6045_v23, %v5706_v3  ;;  %v4701_v12 = vpop.f32.mrb[91].mxu1  ;;  %v4742_v3 = vld [vmem:[%s8668_s3 + $0x60] sm:$0xff] }
 0x445   : > { %v4702_v29 = vadd.f32 %v5703_v54, %v4701_v12  ;;  %6173 = vmatprep.subr.bf16.mxu1 %v6172_v27  ;;  %v4739_v54 = vld [vmem:[%s8668_s3 + $0x48] sm:$0xff] }
 0x446   : > { %6175 = vmatpush3.bf16.msra.mxu1 %v6172_v27  ;;  %v4759_v12 = vld [vmem:[%s8669_s4 + $0x68] sm:$0xff] }
 0x447   : > { %v6176_v35 = vpack.c.bf16 %v4707_v41, %v4702_v29  ;;  %v6048_v55 = vpop.f32.mrb[92].mxu1  ;;  %v4758_v29 = vld [vmem:[%s8669_s4 + $0x60] sm:$0xff] }
 0x448   : > { %v4717_v33 = vadd.f32 %v6048_v55, %v5712_v47  ;;  %v4711_v9 = vpop.f32.mrb[93].mxu1 }
 0x449   : > { %v4712_v1 = vadd.f32 %v5709_v8, %v4711_v9  ;;  %6177 = vmatprep.subr.bf16.mxu1 %v6176_v35  ;;  %v4745_v8 = vld [vmem:[%s8668_s3 + $0x78] sm:$0xff] }
 0x44a   : > { %6179 = vmatpush3.bf16.msra.mxu1 %v6176_v35 }
 0x44b   : > { %v6180_v38 = vpack.c.bf16 %v4717_v33, %v4712_v1  ;;  %v6051_v21 = vpop.f32.mrb[94].mxu1  ;;  %v4761_v1 = vld [vmem:[%s8669_s4 + $0x78] sm:$0xff] }
 0x44c   : > { %v4727_v43 = vadd.f32 %v6051_v21, %v5718_v37  ;;  %v4721_v61 = vpop.f32.mrb[95].mxu1 }
 0x44d   : > { %v4722_v49 = vadd.f32 %v5715_v46, %v4721_v61  ;;  %6181 = vmatprep.subr.bf16.mxu1 %v6180_v38 }
 0x44e   : > { %6183 = vmatpush3.bf16.msra.mxu1 %v6180_v38  ;;  %v4760_v38 = vld [vmem:[%s8669_s4 + $0x70] sm:$0xff] }
 0x44f   : > { %v6184_v40 = vpack.c.bf16 %v4727_v43, %v4722_v49 }
 0x451   : > { %6185 = vmatprep.subr.bf16.mxu1 %v6184_v40 }
 0x452   : > { %6187 = vmatpush3.bf16.msra.mxu1 %v6184_v40 }
 0x455   : > { %6085 = vmatmul.mubr.f32.vlgmr.msra.gmra.mrb[96].mxu1 %v4731_v45 }
 0x456   : > { %6087 = vmatprep.mubr.f32.mxu1 %v4732_v10 }
 0x459   : > { %6088 = vmatmul.mubr.f32.gmra.mrb[98].mxu1 %v4733_v19 }
 0x45a   : > { %6090 = vmatprep.mubr.f32.mxu1 %v4734_v52 }
 0x45d   : > { %6091 = vmatmul.mubr.f32.gmra.mrb[100].mxu1 %v4735_v42 }
 0x45e   : > { %6093 = vmatprep.mubr.f32.mxu1 %v4736_v56 }
 0x461   : > { %6094 = vmatmul.mubr.f32.gmra.mrb[102].mxu1 %v4737_v34 }
 0x462   : > { %6096 = vmatprep.mubr.f32.mxu1 %v4738_v62 }
 0x465   : > { %6097 = vmatmul.mubr.f32.gmra.mrb[104].mxu1 %v4739_v54 }
 0x466   : > { %6099 = vmatprep.mubr.f32.mxu1 %v4740_v57 }
 0x469   : > { %6100 = vmatmul.mubr.f32.gmra.mrb[106].mxu1 %v4741_v44 }
 0x46a   : > { %6102 = vmatprep.mubr.f32.mxu1 %v4742_v3 }
 0x46d   : > { %6103 = vmatmul.mubr.f32.gmra.mrb[108].mxu1 %v4743_v28 }
 0x46e   : > { %6105 = vmatprep.mubr.f32.mxu1 %v4744_v6 }
 0x471   : > { %6106 = vmatmul.mubr.f32.gmra.mrb[110].mxu1 %v4745_v8 }
 0x528   : > { %v6086_v47 = vpop.f32.mrb[96].mxu1 }
 0x529   : > { %v4834_v5 = vadd.f32 %v6086_v47, %v4747_v14  ;;  %v4828_v63 = vpop.f32.mrb[97].mxu1 }
 0x52a   : > { %v4829_v46 = vadd.f32 %v4828_v63, %v4746_v2 }
 0x52b   : > { %4909 = vst.msk [vmem:[%s8586_s29 + $0x8] sm:$0xff] %vm4907_vm12, %v4834_v5 }
 0x52c   : > { %4908 = vst.msk [vmem:[%s8586_s29] sm:$0xff] %vm4907_vm12, %v4829_v46  ;;  %v6089_v37 = vpop.f32.mrb[98].mxu1 }
 0x52d   : > { %v4844_v16 = vadd.f32 %v6089_v37, %v4749_v13  ;;  %v4838_v36 = vpop.f32.mrb[99].mxu1 }
 0x52e   : > { %v4839_v11 = vadd.f32 %v4838_v36, %v4748_v58 }
 0x52f   : > { %4911 = vst.msk [vmem:[%s8586_s29 + $0x18] sm:$0xff] %vm4907_vm12, %v4844_v16 }
 0x530   : > { %4910 = vst.msk [vmem:[%s8586_s29 + $0x10] sm:$0xff] %vm4907_vm12, %v4839_v11  ;;  %v6092_v31 = vpop.f32.mrb[100].mxu1 }
 0x531   : > { %v4854_v30 = vadd.f32 %v6092_v31, %v4751_v0  ;;  %v4848_v25 = vpop.f32.mrb[101].mxu1 }
 0x532   : > { %v4849_v22 = vadd.f32 %v4848_v25, %v4750_v7 }
 0x533   : > { %4913 = vst.msk [vmem:[%s8586_s29 + $0x28] sm:$0xff] %vm4907_vm12, %v4854_v30 }
 0x534   : > { %4912 = vst.msk [vmem:[%s8586_s29 + $0x20] sm:$0xff] %vm4907_vm12, %v4849_v22  ;;  %v6095_v60 = vpop.f32.mrb[102].mxu1 }
 0x535   : > { %v4864_v24 = vadd.f32 %v6095_v60, %v4753_v17  ;;  %v4858_v4 = vpop.f32.mrb[103].mxu1 }
 0x536   : > { %v4859_v32 = vadd.f32 %v4858_v4, %v4752_v48 }
 0x537   : > { %4915 = vst.msk [vmem:[%s8586_s29 + $0x38] sm:$0xff] %vm4907_vm12, %v4864_v24 }
 0x538   : > { %4914 = vst.msk [vmem:[%s8586_s29 + $0x30] sm:$0xff] %vm4907_vm12, %v4859_v32  ;;  %v6098_v51 = vpop.f32.mrb[104].mxu1 }
 0x539   : > { %v4874_v20 = vadd.f32 %v6098_v51, %v4755_v53  ;;  %v4868_v26 = vpop.f32.mrb[105].mxu1 }
 0x53a   : > { %v4869_v50 = vadd.f32 %v4868_v26, %v4754_v18 }
 0x53b   : > { %4917 = vst.msk [vmem:[%s8586_s29 + $0x48] sm:$0xff] %vm4907_vm12, %v4874_v20 }
 0x53c   : > { %4916 = vst.msk [vmem:[%s8586_s29 + $0x40] sm:$0xff] %vm4907_vm12, %v4869_v50  ;;  %v6101_v15 = vpop.f32.mrb[106].mxu1 }
 0x53d   : > { %v4884_v27 = vadd.f32 %v6101_v15, %v4757_v59  ;;  %v4878_v23 = vpop.f32.mrb[107].mxu1 }
 0x53e   : > { %v4879_v41 = vadd.f32 %v4878_v23, %v4756_v39 }
 0x53f   : > { %4919 = vst.msk [vmem:[%s8586_s29 + $0x58] sm:$0xff] %vm4907_vm12, %v4884_v27 }
 0x540   : > { %4918 = vst.msk [vmem:[%s8586_s29 + $0x50] sm:$0xff] %vm4907_vm12, %v4879_v41  ;;  %v6104_v35 = vpop.f32.mrb[108].mxu1 }
 0x541   : > { %v4894_v55 = vadd.f32 %v6104_v35, %v4759_v12  ;;  %v4888_v33 = vpop.f32.mrb[109].mxu1 }
 0x542   : > { %v4889_v9 = vadd.f32 %v4888_v33, %v4758_v29 }
 0x543   : > { %4921 = vst.msk [vmem:[%s8586_s29 + $0x68] sm:$0xff] %vm4907_vm12, %v4894_v55 }
 0x544   : > { %4920 = vst.msk [vmem:[%s8586_s29 + $0x60] sm:$0xff] %vm4907_vm12, %v4889_v9  ;;  %v6107_v21 = vpop.f32.mrb[110].mxu1 }
 0x545   : > { %v4904_v43 = vadd.f32 %v6107_v21, %v4761_v1  ;;  %v4898_v61 = vpop.f32.mrb[111].mxu1 }
 0x546   : > { %v4899_v49 = vadd.f32 %v4898_v61, %v4760_v38 }
 0x547   : > { %4923 = vst.msk [vmem:[%s8586_s29 + $0x78] sm:$0xff] %vm4907_vm12, %v4904_v43 }
 0x548   : > { %4922 = vst.msk [vmem:[%s8586_s29 + $0x70] sm:$0xff] %vm4907_vm12, %v4899_v49 }
 0x549 PF: > { %s18_s24 = sadd.s32 1, %s6603_s24  }
 0x54a   : > { %p15_p4 = scmp.ge.s32.totalorder %s18_s24, 4  }
 0x54c   :  { %17 = sbr.rel (!%p15_p4) target bundleno = 1 (0x1), region = 94 }

</bundles_post_ra>
